<compile_context>
chip_gen: v7x
topology: tpu7x:2x2x1
jax: 0.10.0
libtpu: 0.0.40
codegen_flags: <defaults>
</compile_context>

<pallas_src>
import functools

import jax
import jax.numpy as jnp
from jax.experimental import pallas as pl
from jax.experimental.pallas import tpu as pltpu


VMEM_LIMIT_BYTES = 48 * 1024 * 1024   # explicit scoped-VMEM budget (fits v7x 64 MiB)
NEG_INF = -1e30                       # finite "-inf": NaN-safe for fully padded rows

# Weight/bias blocks never change across the batch grid -> single-buffer them.
# If this JAX/Mosaic build rejects pipeline_mode=pl.Buffered(1), main() flips this
# flag and retries with default double buffering.
_SINGLE_BUFFER_WEIGHTS = [True]


def _const_spec(shape):
    n = len(shape)
    index_map = lambda b: (0,) * n
    if _SINGLE_BUFFER_WEIGHTS[0]:
        try:
            return pl.BlockSpec(shape, index_map, pipeline_mode=pl.Buffered(1))
        except Exception:
            _SINGLE_BUFFER_WEIGHTS[0] = False
    return pl.BlockSpec(shape, index_map)


# ----------------------------------------------------------------------------
# Fused decoder-layer kernel
# ----------------------------------------------------------------------------
def decoder_layer_kernel(x_ref, pad_ref,
                         wqkv_ref, bqkv_ref, wo_ref, bo_ref,
                         g1_ref, be1_ref, g2_ref, be2_ref,
                         wff1_ref, bff1_ref, wff2_ref, bff2_ref,
                         out_ref, *, num_heads, head_dim, training):
    x = x_ref[0]                                   # (S, d) float32
    S, d = x.shape
    H, dk = num_heads, head_dim
    scale = 1.0 / (float(dk) ** 0.5)

    def layer_norm(v, g, b, eps=1e-5):             # f32 statistics
        mu = jnp.mean(v, axis=-1, keepdims=True)
        var = jnp.mean((v - mu) ** 2, axis=-1, keepdims=True)
        return (v - mu) * jax.lax.rsqrt(var + eps) * g + b

    # ---- norm1 -> fused QKV projection (one lane-dense MXU matmul) ----
    xn = layer_norm(x, g1_ref[...], be1_ref[...])
    qkv = jnp.dot(xn.astype(jnp.bfloat16), wqkv_ref[...],
                  preferred_element_type=jnp.float32) + bqkv_ref[...]   # (S, 3*H*dk) f32
    qkv = qkv.reshape(S, 3 * H, dk).transpose(1, 0, 2)                  # (3H, S, dk)
    q = qkv[:H].astype(jnp.bfloat16)                                    # (H, S, dk)
    k = qkv[H:2 * H].astype(jnp.bfloat16)
    v = qkv[2 * H:].astype(jnp.bfloat16)

    # ---- attention, batched over heads (single dot_general per einsum) ----
    s = jnp.einsum('hqd,hkd->hqk', q, k,
                   preferred_element_type=jnp.float32) * scale          # (H, S, S) f32
    if training:
        # Causal mask built in-kernel (no (B,S,S) HBM traffic); padding row is the
        # only mask data shipped.  NEG_INF is finite so fully padded rows stay
        # NaN-free (they degrade to uniform attention instead of NaN).
        rows = jax.lax.broadcasted_iota(jnp.int32, (S, S), 0)
        cols = jax.lax.broadcasted_iota(jnp.int32, (S, S), 1)
        causal = jnp.where(cols > rows, NEG_INF, 0.0).astype(jnp.float32)
        s = s + (causal + pad_ref[0])               # pad_ref[0]: (1, S) row, broadcast
        # TODO(synk): attention dropout (p=0.05, training only) is stochastic; omitted.

    m = jnp.max(s, axis=-1, keepdims=True)
    p = jnp.exp(s - m)
    denom = jnp.sum(p, axis=-1, keepdims=True)
    p = p * pl.reciprocal(denom, approx=True)       # EUP reciprocal, not VALU divide

    ctx = jnp.einsum('hqk,hkd->hqd', p.astype(jnp.bfloat16), v,
                     preferred_element_type=jnp.float32)                # (H, S, dk)
    ctx = ctx.transpose(1, 0, 2).reshape(S, H * dk)                     # concat heads

    attn = jnp.dot(ctx.astype(jnp.bfloat16), wo_ref[...],
                   preferred_element_type=jnp.float32) + bo_ref[...]    # (S, d)
    res1 = attn + x                                                     # residual 1

    # ---- norm2 -> FFN (Linear -> exact GELU -> Linear) -> residual 2 ----
    xn2 = layer_norm(res1, g2_ref[...], be2_ref[...])
    h1 = jnp.dot(xn2.astype(jnp.bfloat16), wff1_ref[...],
                 preferred_element_type=jnp.float32) + bff1_ref[...]
    h1 = 0.5 * h1 * (1.0 + jax.lax.erf(h1 * 0.7071067811865476))        # nn.GELU (exact)
    h2 = jnp.dot(h1.astype(jnp.bfloat16), wff2_ref[...],
                 preferred_element_type=jnp.float32) + bff2_ref[...]

    out_ref[0] = h2 + res1


def decoder_layer(x, pad_row, p, *, num_heads, head_dim, training=False):
    """x: (B,S,d) f32, pad_row: (B,1,S) additive f32 -> (B,S,d) f32."""
    B, S, d = x.shape
    three_hdk = p["wqkv"].shape[1]
    hdk = p["wo"].shape[0]
    dff = p["wff1"].shape[1]

    kernel = functools.partial(decoder_layer_kernel, num_heads=num_heads,
                               head_dim=head_dim, training=training)

    in_specs = [
        pl.BlockSpec((1, S, d), lambda b: (b, 0, 0)),        # x: one batch row / step
        pl.BlockSpec((1, 1, S), lambda b: (b, 0, 0)),        # additive padding row
        _const_spec((d, three_hdk)), _const_spec((1, three_hdk)),   # fused Wqkv, bqkv
        _const_spec((hdk, d)), _const_spec((1, d)),                 # Wo, bo
        _const_spec((1, d)), _const_spec((1, d)),                   # norm1 gamma, beta
        _const_spec((1, d)), _const_spec((1, d)),                   # norm2 gamma, beta
        _const_spec((d, dff)), _const_spec((1, dff)),               # FFN linear 1
        _const_spec((dff, d)), _const_spec((1, d)),                 # FFN linear 2
    ]
    out_spec = pl.BlockSpec((1, S, d), lambda b: (b, 0, 0))

    return pl.pallas_call(
        kernel,
        out_shape=jax.ShapeDtypeStruct((B, S, d), jnp.float32),
        grid=(B,),
        in_specs=in_specs,
        out_specs=out_spec,
        compiler_params=pltpu.CompilerParams(
            dimension_semantics=("parallel",),               # megacore over batch (v7x)
            vmem_limit_bytes=VMEM_LIMIT_BYTES),
    )(x, pad_row,
      p["wqkv"], p["bqkv"], p["wo"], p["bo"],
      p["g1"], p["be1"], p["g2"], p["be2"],
      p["wff1"], p["bff1"], p["wff2"], p["bff2"])


# ----------------------------------------------------------------------------
# Tiled (tied) vocab projection kernel
# ----------------------------------------------------------------------------
def matmul_bias_kernel(x_ref, w_ref, b_ref, o_ref):
    o_ref[...] = (jnp.dot(x_ref[...], w_ref[...],
                          preferred_element_type=jnp.float32) + b_ref[...])


def linear_pallas(x2d, w, b):
    """x2d: (M,K) bf16, w: (K,N) bf16, b: (N,) f32 -> (M,N) f32.  Tiled over M,N."""
    M, K = x2d.shape
    N = w.shape[1]
    tm = M if M <= 256 else 256
    tn = N if N <= 512 else 512
    # TODO(synk): for very large d, also tile K with an f32 VMEM accumulator.
    return pl.pallas_call(
        matmul_bias_kernel,
        out_shape=jax.ShapeDtypeStruct((M, N), jnp.float32),
        grid=(pl.cdiv(M, tm), pl.cdiv(N, tn)),
        in_specs=[pl.BlockSpec((tm, K), lambda i, j: (i, 0)),
                  pl.BlockSpec((K, tn), lambda i, j: (0, j)),
                  pl.BlockSpec((1, tn), lambda i, j: (0, j))],
        out_specs=pl.BlockSpec((tm, tn), lambda i, j: (i, j)),
        compiler_params=pltpu.CompilerParams(
            dimension_semantics=("parallel", "parallel"),
            vmem_limit_bytes=VMEM_LIMIT_BYTES),
    )(x2d, w, b.reshape(1, N))


# ----------------------------------------------------------------------------
# JAX glue: RoPE table, padding row, parameter init, full forward
# ----------------------------------------------------------------------------
def rope_encode(seq_len, d):
    pos = jnp.arange(seq_len, dtype=jnp.float32)
    inv_freq = 1.0 / (10000.0 ** (jnp.arange(0, d, 2, dtype=jnp.float32) / d))
    sinusoid = jnp.einsum("i,d->id", pos, inv_freq)
    return jnp.concatenate([jnp.sin(sinusoid), jnp.cos(sinusoid)], axis=-1)  # (S, d)


def init_params(key, num_layers, H, d, dk, dff, vocab):
    def nrm(k, shape, scale=0.02, dtype=jnp.bfloat16):
        return (scale * jax.random.normal(k, shape, jnp.float32)).astype(dtype)

    keys = jax.random.split(key, num_layers + 2)
    layers = []
    for li in range(num_layers):
        ks = jax.random.split(keys[li], 8)
        layers.append(dict(
            # fused (Q|K|V) projection, heads stacked along the output dim
            wqkv=nrm(ks[0], (d, 3 * H * dk)),
            bqkv=nrm(ks[1], (1, 3 * H * dk), dtype=jnp.float32),
            wo=nrm(ks[2], (H * dk, d)), bo=nrm(ks[3], (1, d), dtype=jnp.float32),
            g1=jnp.ones((1, d), jnp.float32), be1=jnp.zeros((1, d), jnp.float32),
            g2=jnp.ones((1, d), jnp.float32), be2=jnp.zeros((1, d), jnp.float32),
            wff1=nrm(ks[4], (d, dff)), bff1=nrm(ks[5], (1, dff), dtype=jnp.float32),
            wff2=nrm(ks[6], (dff, d)), bff2=nrm(ks[7], (1, d), dtype=jnp.float32),
        ))
    # tied weight: embedding.weight = last_linear.weight -> (vocab, d), bf16.
    w_vocab = nrm(keys[-2], (vocab, d))
    b_vocab = nrm(keys[-1], (vocab,), dtype=jnp.float32)
    return dict(layers=layers, w_vocab=w_vocab,
                w_vocab_t=jnp.transpose(w_vocab),      # pre-transposed ONCE at init
                b_vocab=b_vocab)


def transformer_forward(tokens, params, *, num_heads, head_dim,
                        padding_idx=3, training=False):
    B, S = tokens.shape
    vocab, d = params["w_vocab"].shape
    # embedding (tied with last_linear weight) + scale + RoPE positional code
    emb = jnp.take(params["w_vocab"], tokens, axis=0).astype(jnp.float32)   # (B,S,d)
    x = emb * (d ** 0.5) + rope_encode(S, d)[None, :, :]
    # additive padding row (used only in training mode inside the kernel)
    pad_row = jnp.where(tokens == padding_idx, NEG_INF, 0.0
                        ).astype(jnp.float32)[:, None, :]                   # (B,1,S)
    for lp in params["layers"]:
        x = decoder_layer(x, pad_row, lp, num_heads=num_heads,
                          head_dim=head_dim, training=training)             # Pallas
    logits = linear_pallas(x.reshape(B * S, d).astype(jnp.bfloat16),
                           params["w_vocab_t"], params["b_vocab"])          # Pallas
    return logits.reshape(B, S, vocab)


# ----------------------------------------------------------------------------
# Pure-JAX f32 reference (same weights, same math) for a correctness check
# ----------------------------------------------------------------------------
def reference_forward(tokens, params, *, num_heads, head_dim,
                      padding_idx=3, training=False):
    B, S = tokens.shape
    vocab, d = params["w_vocab"].shape
    H, dk = num_heads, head_dim
    f32 = lambda a: a.astype(jnp.float32)

    emb = f32(jnp.take(params["w_vocab"], tokens, axis=0))
    x = emb * (d ** 0.5) + rope_encode(S, d)[None, :, :]
    if training:
        causal = jnp.where(jnp.arange(S)[None, :] > jnp.arange(S)[:, None],
                           NEG_INF, 0.0).astype(jnp.float32)
        pad = jnp.where(tokens == padding_idx, NEG_INF, 0.0).astype(jnp.float32)
        mask = causal[None] + pad[:, None, :]
    else:
        mask = jnp.zeros((B, S, S), jnp.float32)

    def ln(v, g, b, eps=1e-5):
        mu = jnp.mean(v, axis=-1, keepdims=True)
        var = jnp.mean((v - mu) ** 2, axis=-1, keepdims=True)
        return (v - mu) * jax.lax.rsqrt(var + eps) * g + b

    for p in params["layers"]:
        xn = ln(x, f32(p["g1"]), f32(p["be1"]))
        qkv = xn @ f32(p["wqkv"]) + f32(p["bqkv"])            # (B,S,3*H*dk)
        qkv = qkv.reshape(B, S, 3 * H, dk)
        q, k, v = qkv[:, :, :H], qkv[:, :, H:2 * H], qkv[:, :, 2 * H:]
        s = jnp.einsum('bqhd,bkhd->bhqk', q, k) / (dk ** 0.5) + mask[:, None]
        pr = jax.nn.softmax(s, axis=-1)
        ctx = jnp.einsum('bhqk,bkhd->bqhd', pr, v).reshape(B, S, H * dk)
        res1 = ctx @ f32(p["wo"]) + f32(p["bo"]) + x
        xn2 = ln(res1, f32(p["g2"]), f32(p["be2"]))
        h1 = xn2 @ f32(p["wff1"]) + f32(p["bff1"])
        h1 = 0.5 * h1 * (1.0 + jax.lax.erf(h1 * 0.7071067811865476))
        x = h1 @ f32(p["wff2"]) + f32(p["bff2"]) + res1
    return x @ f32(params["w_vocab"]).T + f32(params["b_vocab"])


# ----------------------------------------------------------------------------
if __name__ == "__main__":
    # small config consistent with the module's constructor
    DECODER_NUM, HEAD_NUM, D, DK, DFF = 2, 2, 32, 16, 64
    VOCAB, PAD_IDX = 128, 3
    B, S = 2, 8

    key = jax.random.PRNGKey(0)
    k_par, k_tok = jax.random.split(key)
    params = init_params(k_par, DECODER_NUM, HEAD_NUM, D, DK, DFF, VOCAB)
    tokens = jax.random.randint(k_tok, (B, S), 0, VOCAB, dtype=jnp.int32)

    fwd = functools.partial(transformer_forward, num_heads=HEAD_NUM, head_dim=DK,
                            padding_idx=PAD_IDX, training=False)
    try:
        logits = jax.block_until_ready(fwd(tokens, params))
    except Exception:
        # Fallback: this JAX/Mosaic build rejected single-buffered weight blocks
        # (pl.Buffered(1)); retry with default double buffering.
        _SINGLE_BUFFER_WEIGHTS[0] = False
        logits = jax.block_until_ready(fwd(tokens, params))

    assert logits.shape == (B, S, VOCAB) and logits.dtype == jnp.float32

    ref = jax.block_until_ready(
        reference_forward(tokens, params, num_heads=HEAD_NUM, head_dim=DK,
                          padding_idx=PAD_IDX, training=False))
    max_err = float(jnp.max(jnp.abs(logits - ref)))
    assert jnp.allclose(logits, ref, atol=1e-2, rtol=1e-2), (
        f"mismatch vs reference, max abs err = {max_err}")

    print("KERNEL_OK")
</pallas_src>

<mosaic_0001>
module attributes {stable_mosaic.version = 11 : i64} {
  func.func @decoder_layer_kernel(%arg0: i32, %arg1: memref<1x8x32xf32, #tpu.memory_space<vmem>>, %arg2: memref<1x1x8xf32, #tpu.memory_space<vmem>>, %arg3: memref<32x96xbf16, #tpu.memory_space<vmem>>, %arg4: memref<1x96xf32, #tpu.memory_space<vmem>>, %arg5: memref<32x32xbf16, #tpu.memory_space<vmem>>, %arg6: memref<1x32xf32, #tpu.memory_space<vmem>>, %arg7: memref<1x32xf32, #tpu.memory_space<vmem>>, %arg8: memref<1x32xf32, #tpu.memory_space<vmem>>, %arg9: memref<1x32xf32, #tpu.memory_space<vmem>>, %arg10: memref<1x32xf32, #tpu.memory_space<vmem>>, %arg11: memref<32x64xbf16, #tpu.memory_space<vmem>>, %arg12: memref<1x64xf32, #tpu.memory_space<vmem>>, %arg13: memref<64x32xbf16, #tpu.memory_space<vmem>>, %arg14: memref<1x32xf32, #tpu.memory_space<vmem>>, %arg15: memref<1x8x32xf32, #tpu.memory_space<vmem>>) attributes {dimension_semantics = [#tpu.dimension_semantics<parallel>], iteration_bounds = array<i64: 2>, scalar_prefetch = 0 : i64, scratch_operands = 0 : i64, tpu.core_type = #tpu.core_type<tc>, window_params = [{transform_indices = @transform_0, window_bounds = array<i64: 1, 8, 32>}, {transform_indices = @transform_1, window_bounds = array<i64: 1, 1, 8>}, {pipeline_mode = #tpu.pipeline_mode<synchronous>, transform_indices = @transform_2, window_bounds = array<i64: 32, 96>}, {pipeline_mode = #tpu.pipeline_mode<synchronous>, transform_indices = @transform_3, window_bounds = array<i64: 1, 96>}, {pipeline_mode = #tpu.pipeline_mode<synchronous>, transform_indices = @transform_4, window_bounds = array<i64: 32, 32>}, {pipeline_mode = #tpu.pipeline_mode<synchronous>, transform_indices = @transform_5, window_bounds = array<i64: 1, 32>}, {pipeline_mode = #tpu.pipeline_mode<synchronous>, transform_indices = @transform_6, window_bounds = array<i64: 1, 32>}, {pipeline_mode = #tpu.pipeline_mode<synchronous>, transform_indices = @transform_7, window_bounds = array<i64: 1, 32>}, {pipeline_mode = #tpu.pipeline_mode<synchronous>, transform_indices = @transform_8, window_bounds = array<i64: 1, 32>}, {pipeline_mode = #tpu.pipeline_mode<synchronous>, transform_indices = @transform_9, window_bounds = array<i64: 1, 32>}, {pipeline_mode = #tpu.pipeline_mode<synchronous>, transform_indices = @transform_10, window_bounds = array<i64: 32, 64>}, {pipeline_mode = #tpu.pipeline_mode<synchronous>, transform_indices = @transform_11, window_bounds = array<i64: 1, 64>}, {pipeline_mode = #tpu.pipeline_mode<synchronous>, transform_indices = @transform_12, window_bounds = array<i64: 64, 32>}, {pipeline_mode = #tpu.pipeline_mode<synchronous>, transform_indices = @transform_13, window_bounds = array<i64: 1, 32>}, {transform_indices = @transform_14, window_bounds = array<i64: 1, 8, 32>}]} {
    %c0 = arith.constant 0 : index
    %c0_0 = arith.constant 0 : index
    %c0_1 = arith.constant 0 : index
    %0 = vector.load %arg1[%c0, %c0_0, %c0_1] : memref<1x8x32xf32, #tpu.memory_space<vmem>>, vector<1x8x32xf32>
    %1 = vector.shape_cast %0 : vector<1x8x32xf32> to vector<8x32xf32>
    %c0_2 = arith.constant 0 : index
    %c0_3 = arith.constant 0 : index
    %2 = vector.load %arg7[%c0_2, %c0_3] : memref<1x32xf32, #tpu.memory_space<vmem>>, vector<1x32xf32>
    %c0_4 = arith.constant 0 : index
    %c0_5 = arith.constant 0 : index
    %3 = vector.load %arg8[%c0_4, %c0_5] : memref<1x32xf32, #tpu.memory_space<vmem>>, vector<1x32xf32>
    %cst = arith.constant dense<0.000000e+00> : vector<8xf32>
    %4 = vector.multi_reduction <add>, %1, %cst [1] : vector<8x32xf32> to vector<8xf32>
    %5 = vector.shape_cast %4 : vector<8xf32> to vector<8x1xf32>
    %cst_6 = arith.constant 3.200000e+01 : f32
    %6 = vector.broadcast %cst_6 : f32 to vector<8x1xf32>
    %7 = arith.divf %5, %6 : vector<8x1xf32>
    %8 = vector.broadcast %7 : vector<8x1xf32> to vector<8x32xf32>
    %9 = arith.subf %1, %8 : vector<8x32xf32>
    %10 = arith.mulf %9, %9 : vector<8x32xf32>
    %cst_7 = arith.constant dense<0.000000e+00> : vector<8xf32>
    %11 = vector.multi_reduction <add>, %10, %cst_7 [1] : vector<8x32xf32> to vector<8xf32>
    %12 = vector.shape_cast %11 : vector<8xf32> to vector<8x1xf32>
    %cst_8 = arith.constant 3.200000e+01 : f32
    %13 = vector.broadcast %cst_8 : f32 to vector<8x1xf32>
    %14 = arith.divf %12, %13 : vector<8x1xf32>
    %15 = vector.broadcast %7 : vector<8x1xf32> to vector<8x32xf32>
    %16 = arith.subf %1, %15 : vector<8x32xf32>
    %cst_9 = arith.constant 9.99999974E-6 : f32
    %17 = vector.broadcast %cst_9 : f32 to vector<8x1xf32>
    %18 = arith.addf %14, %17 : vector<8x1xf32>
    %19 = math.rsqrt %18 : vector<8x1xf32>
    %20 = vector.broadcast %19 : vector<8x1xf32> to vector<8x32xf32>
    %21 = arith.mulf %16, %20 : vector<8x32xf32>
    %22 = vector.broadcast %2 : vector<1x32xf32> to vector<8x32xf32>
    %23 = arith.mulf %21, %22 : vector<8x32xf32>
    %24 = vector.broadcast %3 : vector<1x32xf32> to vector<8x32xf32>
    %25 = arith.addf %23, %24 : vector<8x32xf32>
    %26 = arith.truncf %25 : vector<8x32xf32> to vector<8x32xbf16>
    %c0_10 = arith.constant 0 : index
    %c0_11 = arith.constant 0 : index
    %27 = vector.load %arg3[%c0_10, %c0_11] : memref<32x96xbf16, #tpu.memory_space<vmem>>, vector<32x96xbf16>
    %cst_12 = arith.constant dense<0.000000e+00> : vector<8x96xf32>
    %28 = tpu.matmul %26, %27, %cst_12 {dimension_numbers = #tpu.dot_dimension_numbers<[1], [0], [0], [1], [0, 0, 1, 1], [], []>} : vector<8x32xbf16>, vector<32x96xbf16>, vector<8x96xf32> -> vector<8x96xf32>
    %c0_13 = arith.constant 0 : index
    %c0_14 = arith.constant 0 : index
    %29 = vector.load %arg4[%c0_13, %c0_14] : memref<1x96xf32, #tpu.memory_space<vmem>>, vector<1x96xf32>
    %30 = vector.broadcast %29 : vector<1x96xf32> to vector<8x96xf32>
    %31 = arith.addf %28, %30 : vector<8x96xf32>
    %32 = vector.shape_cast %31 : vector<8x96xf32> to vector<8x6x16xf32>
    %33 = tpu.transpose %32, [1, 0, 2] : vector<8x6x16xf32> -> vector<6x8x16xf32>
    %34 = vector.extract_strided_slice %33 {offsets = [0, 0, 0], sizes = [2, 8, 16], strides = [1, 1, 1]} : vector<6x8x16xf32> to vector<2x8x16xf32>
    %35 = arith.truncf %34 : vector<2x8x16xf32> to vector<2x8x16xbf16>
    %36 = vector.extract_strided_slice %33 {offsets = [2, 0, 0], sizes = [2, 8, 16], strides = [1, 1, 1]} : vector<6x8x16xf32> to vector<2x8x16xf32>
    %37 = arith.truncf %36 : vector<2x8x16xf32> to vector<2x8x16xbf16>
    %38 = vector.extract_strided_slice %33 {offsets = [4, 0, 0], sizes = [2, 8, 16], strides = [1, 1, 1]} : vector<6x8x16xf32> to vector<2x8x16xf32>
    %39 = arith.truncf %38 : vector<2x8x16xf32> to vector<2x8x16xbf16>
    "tpu.trace_start"() <{level = 10 : i32, message = "hqd,hkd->hqk"}> : () -> ()
    %cst_15 = arith.constant dense<0.000000e+00> : vector<2x8x8xf32>
    %40 = tpu.matmul %35, %37, %cst_15 {dimension_numbers = #tpu.dot_dimension_numbers<[2], [2], [1], [1], [0, 0, 0, 1, 1, 1], [0], [0]>} : vector<2x8x16xbf16>, vector<2x8x16xbf16>, vector<2x8x8xf32> -> vector<2x8x8xf32>
    "tpu.trace_stop"() : () -> ()
    %cst_16 = arith.constant 2.500000e-01 : f32
    %41 = vector.broadcast %cst_16 : f32 to vector<2x8x8xf32>
    %42 = arith.mulf %40, %41 : vector<2x8x8xf32>
    %cst_17 = arith.constant dense<0xFF800000> : vector<2x8xf32>
    %43 = vector.multi_reduction <maximumf>, %42, %cst_17 [2] : vector<2x8x8xf32> to vector<2x8xf32>
    %44 = vector.shape_cast %43 : vector<2x8xf32> to vector<2x8x1xf32>
    %45 = vector.broadcast %44 : vector<2x8x1xf32> to vector<2x8x8xf32>
    %46 = arith.subf %42, %45 : vector<2x8x8xf32>
    %47 = math.exp %46 : vector<2x8x8xf32>
    %cst_18 = arith.constant dense<0.000000e+00> : vector<2x8xf32>
    %48 = vector.multi_reduction <add>, %47, %cst_18 [2] : vector<2x8x8xf32> to vector<2x8xf32>
    %49 = vector.shape_cast %48 : vector<2x8xf32> to vector<2x8x1xf32>
    %50 = tpu.reciprocal %49 {approx = true} : vector<2x8x1xf32> -> vector<2x8x1xf32>
    %51 = vector.broadcast %50 : vector<2x8x1xf32> to vector<2x8x8xf32>
    %52 = arith.mulf %47, %51 : vector<2x8x8xf32>
    %53 = arith.truncf %52 : vector<2x8x8xf32> to vector<2x8x8xbf16>
    "tpu.trace_start"() <{level = 10 : i32, message = "hqk,hkd->hqd"}> : () -> ()
    %cst_19 = arith.constant dense<0.000000e+00> : vector<2x8x16xf32>
    %54 = tpu.matmul %53, %39, %cst_19 {dimension_numbers = #tpu.dot_dimension_numbers<[2], [1], [1], [2], [0, 0, 0, 1, 1, 2], [0], [0]>} : vector<2x8x8xbf16>, vector<2x8x16xbf16>, vector<2x8x16xf32> -> vector<2x8x16xf32>
    "tpu.trace_stop"() : () -> ()
    %55 = tpu.transpose %54, [1, 0, 2] : vector<2x8x16xf32> -> vector<8x2x16xf32>
    %56 = vector.shape_cast %55 : vector<8x2x16xf32> to vector<8x32xf32>
    %57 = arith.truncf %56 : vector<8x32xf32> to vector<8x32xbf16>
    %c0_20 = arith.constant 0 : index
    %c0_21 = arith.constant 0 : index
    %58 = vector.load %arg5[%c0_20, %c0_21] : memref<32x32xbf16, #tpu.memory_space<vmem>>, vector<32x32xbf16>
    %cst_22 = arith.constant dense<0.000000e+00> : vector<8x32xf32>
    %59 = tpu.matmul %57, %58, %cst_22 {dimension_numbers = #tpu.dot_dimension_numbers<[1], [0], [0], [1], [0, 0, 1, 1], [], []>} : vector<8x32xbf16>, vector<32x32xbf16>, vector<8x32xf32> -> vector<8x32xf32>
    %c0_23 = arith.constant 0 : index
    %c0_24 = arith.constant 0 : index
    %60 = vector.load %arg6[%c0_23, %c0_24] : memref<1x32xf32, #tpu.memory_space<vmem>>, vector<1x32xf32>
    %61 = vector.broadcast %60 : vector<1x32xf32> to vector<8x32xf32>
    %62 = arith.addf %59, %61 : vector<8x32xf32>
    %63 = arith.addf %62, %1 : vector<8x32xf32>
    %c0_25 = arith.constant 0 : index
    %c0_26 = arith.constant 0 : index
    %64 = vector.load %arg9[%c0_25, %c0_26] : memref<1x32xf32, #tpu.memory_space<vmem>>, vector<1x32xf32>
    %c0_27 = arith.constant 0 : index
    %c0_28 = arith.constant 0 : index
    %65 = vector.load %arg10[%c0_27, %c0_28] : memref<1x32xf32, #tpu.memory_space<vmem>>, vector<1x32xf32>
    %cst_29 = arith.constant dense<0.000000e+00> : vector<8xf32>
    %66 = vector.multi_reduction <add>, %63, %cst_29 [1] : vector<8x32xf32> to vector<8xf32>
    %67 = vector.shape_cast %66 : vector<8xf32> to vector<8x1xf32>
    %cst_30 = arith.constant 3.200000e+01 : f32
    %68 = vector.broadcast %cst_30 : f32 to vector<8x1xf32>
    %69 = arith.divf %67, %68 : vector<8x1xf32>
    %70 = vector.broadcast %69 : vector<8x1xf32> to vector<8x32xf32>
    %71 = arith.subf %63, %70 : vector<8x32xf32>
    %72 = arith.mulf %71, %71 : vector<8x32xf32>
    %cst_31 = arith.constant dense<0.000000e+00> : vector<8xf32>
    %73 = vector.multi_reduction <add>, %72, %cst_31 [1] : vector<8x32xf32> to vector<8xf32>
    %74 = vector.shape_cast %73 : vector<8xf32> to vector<8x1xf32>
    %cst_32 = arith.constant 3.200000e+01 : f32
    %75 = vector.broadcast %cst_32 : f32 to vector<8x1xf32>
    %76 = arith.divf %74, %75 : vector<8x1xf32>
    %77 = vector.broadcast %69 : vector<8x1xf32> to vector<8x32xf32>
    %78 = arith.subf %63, %77 : vector<8x32xf32>
    %cst_33 = arith.constant 9.99999974E-6 : f32
    %79 = vector.broadcast %cst_33 : f32 to vector<8x1xf32>
    %80 = arith.addf %76, %79 : vector<8x1xf32>
    %81 = math.rsqrt %80 : vector<8x1xf32>
    %82 = vector.broadcast %81 : vector<8x1xf32> to vector<8x32xf32>
    %83 = arith.mulf %78, %82 : vector<8x32xf32>
    %84 = vector.broadcast %64 : vector<1x32xf32> to vector<8x32xf32>
    %85 = arith.mulf %83, %84 : vector<8x32xf32>
    %86 = vector.broadcast %65 : vector<1x32xf32> to vector<8x32xf32>
    %87 = arith.addf %85, %86 : vector<8x32xf32>
    %88 = arith.truncf %87 : vector<8x32xf32> to vector<8x32xbf16>
    %c0_34 = arith.constant 0 : index
    %c0_35 = arith.constant 0 : index
    %89 = vector.load %arg11[%c0_34, %c0_35] : memref<32x64xbf16, #tpu.memory_space<vmem>>, vector<32x64xbf16>
    %cst_36 = arith.constant dense<0.000000e+00> : vector<8x64xf32>
    %90 = tpu.matmul %88, %89, %cst_36 {dimension_numbers = #tpu.dot_dimension_numbers<[1], [0], [0], [1], [0, 0, 1, 1], [], []>} : vector<8x32xbf16>, vector<32x64xbf16>, vector<8x64xf32> -> vector<8x64xf32>
    %c0_37 = arith.constant 0 : index
    %c0_38 = arith.constant 0 : index
    %91 = vector.load %arg12[%c0_37, %c0_38] : memref<1x64xf32, #tpu.memory_space<vmem>>, vector<1x64xf32>
    %92 = vector.broadcast %91 : vector<1x64xf32> to vector<8x64xf32>
    %93 = arith.addf %90, %92 : vector<8x64xf32>
    %cst_39 = arith.constant 5.000000e-01 : f32
    %94 = vector.broadcast %cst_39 : f32 to vector<8x64xf32>
    %95 = arith.mulf %94, %93 : vector<8x64xf32>
    %cst_40 = arith.constant 0.707106769 : f32
    %96 = vector.broadcast %cst_40 : f32 to vector<8x64xf32>
    %97 = arith.mulf %93, %96 : vector<8x64xf32>
    %98 = math.erf %97 : vector<8x64xf32>
    %cst_41 = arith.constant 1.000000e+00 : f32
    %99 = vector.broadcast %cst_41 : f32 to vector<8x64xf32>
    %100 = arith.addf %99, %98 : vector<8x64xf32>
    %101 = arith.mulf %95, %100 : vector<8x64xf32>
    %102 = arith.truncf %101 : vector<8x64xf32> to vector<8x64xbf16>
    %c0_42 = arith.constant 0 : index
    %c0_43 = arith.constant 0 : index
    %103 = vector.load %arg13[%c0_42, %c0_43] : memref<64x32xbf16, #tpu.memory_space<vmem>>, vector<64x32xbf16>
    %cst_44 = arith.constant dense<0.000000e+00> : vector<8x32xf32>
    %104 = tpu.matmul %102, %103, %cst_44 {dimension_numbers = #tpu.dot_dimension_numbers<[1], [0], [0], [1], [0, 0, 1, 1], [], []>} : vector<8x64xbf16>, vector<64x32xbf16>, vector<8x32xf32> -> vector<8x32xf32>
    %c0_45 = arith.constant 0 : index
    %c0_46 = arith.constant 0 : index
    %105 = vector.load %arg14[%c0_45, %c0_46] : memref<1x32xf32, #tpu.memory_space<vmem>>, vector<1x32xf32>
    %106 = vector.broadcast %105 : vector<1x32xf32> to vector<8x32xf32>
    %107 = arith.addf %104, %106 : vector<8x32xf32>
    %108 = arith.addf %107, %63 : vector<8x32xf32>
    %c0_47 = arith.constant 0 : index
    %c0_48 = arith.constant 0 : index
    %c0_49 = arith.constant 0 : index
    %109 = vector.load %arg15[%c0_47, %c0_48, %c0_49] : memref<1x8x32xf32, #tpu.memory_space<vmem>>, vector<1x8x32xf32>
    %110 = vector.shape_cast %109 : vector<1x8x32xf32> to vector<8x32xf32>
    %111 = vector.shape_cast %108 : vector<8x32xf32> to vector<1x8x32xf32>
    tpu.vector_store %arg15[%c0_47, %c0_48, %c0_49], %111 {strides = array<i32>} : memref<1x8x32xf32, #tpu.memory_space<vmem>>, vector<1x8x32xf32>,
    return
  }
  func.func @transform_0(%arg0: i32) -> (i32, i32, i32) {
    %c0_i32 = arith.constant 0 : i32
    %c0_i32_0 = arith.constant 0 : i32
    %c0_i32_1 = arith.constant 0 : i32
    return %arg0, %c0_i32, %c0_i32_0 : i32, i32, i32
  }
  func.func @transform_1(%arg0: i32) -> (i32, i32, i32) {
    %c0_i32 = arith.constant 0 : i32
    %c0_i32_0 = arith.constant 0 : i32
    %c0_i32_1 = arith.constant 0 : i32
    return %arg0, %c0_i32, %c0_i32_0 : i32, i32, i32
  }
  func.func @transform_2(%arg0: i32) -> (i32, i32) {
    %c0_i32 = arith.constant 0 : i32
    %c0_i32_0 = arith.constant 0 : i32
    %c0_i32_1 = arith.constant 0 : i32
    return %c0_i32, %c0_i32_0 : i32, i32
  }
  func.func @transform_3(%arg0: i32) -> (i32, i32) {
    %c0_i32 = arith.constant 0 : i32
    %c0_i32_0 = arith.constant 0 : i32
    %c0_i32_1 = arith.constant 0 : i32
    return %c0_i32, %c0_i32_0 : i32, i32
  }
  func.func @transform_4(%arg0: i32) -> (i32, i32) {
    %c0_i32 = arith.constant 0 : i32
    %c0_i32_0 = arith.constant 0 : i32
    %c0_i32_1 = arith.constant 0 : i32
    return %c0_i32, %c0_i32_0 : i32, i32
  }
  func.func @transform_5(%arg0: i32) -> (i32, i32) {
    %c0_i32 = arith.constant 0 : i32
    %c0_i32_0 = arith.constant 0 : i32
    %c0_i32_1 = arith.constant 0 : i32
    return %c0_i32, %c0_i32_0 : i32, i32
  }
  func.func @transform_6(%arg0: i32) -> (i32, i32) {
    %c0_i32 = arith.constant 0 : i32
    %c0_i32_0 = arith.constant 0 : i32
    %c0_i32_1 = arith.constant 0 : i32
    return %c0_i32, %c0_i32_0 : i32, i32
  }
  func.func @transform_7(%arg0: i32) -> (i32, i32) {
    %c0_i32 = arith.constant 0 : i32
    %c0_i32_0 = arith.constant 0 : i32
    %c0_i32_1 = arith.constant 0 : i32
    return %c0_i32, %c0_i32_0 : i32, i32
  }
  func.func @transform_8(%arg0: i32) -> (i32, i32) {
    %c0_i32 = arith.constant 0 : i32
    %c0_i32_0 = arith.constant 0 : i32
    %c0_i32_1 = arith.constant 0 : i32
    return %c0_i32, %c0_i32_0 : i32, i32
  }
  func.func @transform_9(%arg0: i32) -> (i32, i32) {
    %c0_i32 = arith.constant 0 : i32
    %c0_i32_0 = arith.constant 0 : i32
    %c0_i32_1 = arith.constant 0 : i32
    return %c0_i32, %c0_i32_0 : i32, i32
  }
  func.func @transform_10(%arg0: i32) -> (i32, i32) {
    %c0_i32 = arith.constant 0 : i32
    %c0_i32_0 = arith.constant 0 : i32
    %c0_i32_1 = arith.constant 0 : i32
    return %c0_i32, %c0_i32_0 : i32, i32
  }
  func.func @transform_11(%arg0: i32) -> (i32, i32) {
    %c0_i32 = arith.constant 0 : i32
    %c0_i32_0 = arith.constant 0 : i32
    %c0_i32_1 = arith.constant 0 : i32
    return %c0_i32, %c0_i32_0 : i32, i32
  }
  func.func @transform_12(%arg0: i32) -> (i32, i32) {
    %c0_i32 = arith.constant 0 : i32
    %c0_i32_0 = arith.constant 0 : i32
    %c0_i32_1 = arith.constant 0 : i32
    return %c0_i32, %c0_i32_0 : i32, i32
  }
  func.func @transform_13(%arg0: i32) -> (i32, i32) {
    %c0_i32 = arith.constant 0 : i32
    %c0_i32_0 = arith.constant 0 : i32
    %c0_i32_1 = arith.constant 0 : i32
    return %c0_i32, %c0_i32_0 : i32, i32
  }
  func.func @transform_14(%arg0: i32) -> (i32, i32, i32) {
    %c0_i32 = arith.constant 0 : i32
    %c0_i32_0 = arith.constant 0 : i32
    %c0_i32_1 = arith.constant 0 : i32
    return %arg0, %c0_i32, %c0_i32_0 : i32, i32, i32
  }
}

module attributes {stable_mosaic.version = 11 : i64} {
  func.func @decoder_layer_kernel(%arg0: i32, %arg1: memref<1x8x32xf32, #tpu.memory_space<vmem>>, %arg2: memref<1x1x8xf32, #tpu.memory_space<vmem>>, %arg3: memref<32x96xbf16, #tpu.memory_space<vmem>>, %arg4: memref<1x96xf32, #tpu.memory_space<vmem>>, %arg5: memref<32x32xbf16, #tpu.memory_space<vmem>>, %arg6: memref<1x32xf32, #tpu.memory_space<vmem>>, %arg7: memref<1x32xf32, #tpu.memory_space<vmem>>, %arg8: memref<1x32xf32, #tpu.memory_space<vmem>>, %arg9: memref<1x32xf32, #tpu.memory_space<vmem>>, %arg10: memref<1x32xf32, #tpu.memory_space<vmem>>, %arg11: memref<32x64xbf16, #tpu.memory_space<vmem>>, %arg12: memref<1x64xf32, #tpu.memory_space<vmem>>, %arg13: memref<64x32xbf16, #tpu.memory_space<vmem>>, %arg14: memref<1x32xf32, #tpu.memory_space<vmem>>, %arg15: memref<1x8x32xf32, #tpu.memory_space<vmem>>) attributes {dimension_semantics = [#tpu.dimension_semantics<parallel>], iteration_bounds = array<i64: 2>, scalar_prefetch = 0 : i64, scratch_operands = 0 : i64, tpu.core_type = #tpu.core_type<tc>, window_params = [{transform_indices = @transform_0, window_bounds = array<i64: 1, 8, 32>}, {transform_indices = @transform_1, window_bounds = array<i64: 1, 1, 8>}, {pipeline_mode = #tpu.pipeline_mode<synchronous>, transform_indices = @transform_2, window_bounds = array<i64: 32, 96>}, {pipeline_mode = #tpu.pipeline_mode<synchronous>, transform_indices = @transform_3, window_bounds = array<i64: 1, 96>}, {pipeline_mode = #tpu.pipeline_mode<synchronous>, transform_indices = @transform_4, window_bounds = array<i64: 32, 32>}, {pipeline_mode = #tpu.pipeline_mode<synchronous>, transform_indices = @transform_5, window_bounds = array<i64: 1, 32>}, {pipeline_mode = #tpu.pipeline_mode<synchronous>, transform_indices = @transform_6, window_bounds = array<i64: 1, 32>}, {pipeline_mode = #tpu.pipeline_mode<synchronous>, transform_indices = @transform_7, window_bounds = array<i64: 1, 32>}, {pipeline_mode = #tpu.pipeline_mode<synchronous>, transform_indices = @transform_8, window_bounds = array<i64: 1, 32>}, {pipeline_mode = #tpu.pipeline_mode<synchronous>, transform_indices = @transform_9, window_bounds = array<i64: 1, 32>}, {pipeline_mode = #tpu.pipeline_mode<synchronous>, transform_indices = @transform_10, window_bounds = array<i64: 32, 64>}, {pipeline_mode = #tpu.pipeline_mode<synchronous>, transform_indices = @transform_11, window_bounds = array<i64: 1, 64>}, {pipeline_mode = #tpu.pipeline_mode<synchronous>, transform_indices = @transform_12, window_bounds = array<i64: 64, 32>}, {pipeline_mode = #tpu.pipeline_mode<synchronous>, transform_indices = @transform_13, window_bounds = array<i64: 1, 32>}, {transform_indices = @transform_14, window_bounds = array<i64: 1, 8, 32>}]} {
    %c0 = arith.constant 0 : index
    %c0_0 = arith.constant 0 : index
    %c0_1 = arith.constant 0 : index
    %0 = vector.load %arg1[%c0, %c0_0, %c0_1] : memref<1x8x32xf32, #tpu.memory_space<vmem>>, vector<1x8x32xf32>
    %1 = vector.shape_cast %0 : vector<1x8x32xf32> to vector<8x32xf32>
    %c0_2 = arith.constant 0 : index
    %c0_3 = arith.constant 0 : index
    %2 = vector.load %arg7[%c0_2, %c0_3] : memref<1x32xf32, #tpu.memory_space<vmem>>, vector<1x32xf32>
    %c0_4 = arith.constant 0 : index
    %c0_5 = arith.constant 0 : index
    %3 = vector.load %arg8[%c0_4, %c0_5] : memref<1x32xf32, #tpu.memory_space<vmem>>, vector<1x32xf32>
    %cst = arith.constant dense<0.000000e+00> : vector<8xf32>
    %4 = vector.multi_reduction <add>, %1, %cst [1] : vector<8x32xf32> to vector<8xf32>
    %5 = vector.shape_cast %4 : vector<8xf32> to vector<8x1xf32>
    %cst_6 = arith.constant 3.200000e+01 : f32
    %6 = vector.broadcast %cst_6 : f32 to vector<8x1xf32>
    %7 = arith.divf %5, %6 : vector<8x1xf32>
    %8 = vector.broadcast %7 : vector<8x1xf32> to vector<8x32xf32>
    %9 = arith.subf %1, %8 : vector<8x32xf32>
    %10 = arith.mulf %9, %9 : vector<8x32xf32>
    %cst_7 = arith.constant dense<0.000000e+00> : vector<8xf32>
    %11 = vector.multi_reduction <add>, %10, %cst_7 [1] : vector<8x32xf32> to vector<8xf32>
    %12 = vector.shape_cast %11 : vector<8xf32> to vector<8x1xf32>
    %cst_8 = arith.constant 3.200000e+01 : f32
    %13 = vector.broadcast %cst_8 : f32 to vector<8x1xf32>
    %14 = arith.divf %12, %13 : vector<8x1xf32>
    %15 = vector.broadcast %7 : vector<8x1xf32> to vector<8x32xf32>
    %16 = arith.subf %1, %15 : vector<8x32xf32>
    %cst_9 = arith.constant 9.99999974E-6 : f32
    %17 = vector.broadcast %cst_9 : f32 to vector<8x1xf32>
    %18 = arith.addf %14, %17 : vector<8x1xf32>
    %19 = math.rsqrt %18 : vector<8x1xf32>
    %20 = vector.broadcast %19 : vector<8x1xf32> to vector<8x32xf32>
    %21 = arith.mulf %16, %20 : vector<8x32xf32>
    %22 = vector.broadcast %2 : vector<1x32xf32> to vector<8x32xf32>
    %23 = arith.mulf %21, %22 : vector<8x32xf32>
    %24 = vector.broadcast %3 : vector<1x32xf32> to vector<8x32xf32>
    %25 = arith.addf %23, %24 : vector<8x32xf32>
    %26 = arith.truncf %25 : vector<8x32xf32> to vector<8x32xbf16>
    %c0_10 = arith.constant 0 : index
    %c0_11 = arith.constant 0 : index
    %27 = vector.load %arg3[%c0_10, %c0_11] : memref<32x96xbf16, #tpu.memory_space<vmem>>, vector<32x96xbf16>
    %cst_12 = arith.constant dense<0.000000e+00> : vector<8x96xf32>
    %28 = tpu.matmul %26, %27, %cst_12 {dimension_numbers = #tpu.dot_dimension_numbers<[1], [0], [0], [1], [0, 0, 1, 1], [], []>} : vector<8x32xbf16>, vector<32x96xbf16>, vector<8x96xf32> -> vector<8x96xf32>
    %c0_13 = arith.constant 0 : index
    %c0_14 = arith.constant 0 : index
    %29 = vector.load %arg4[%c0_13, %c0_14] : memref<1x96xf32, #tpu.memory_space<vmem>>, vector<1x96xf32>
    %30 = vector.broadcast %29 : vector<1x96xf32> to vector<8x96xf32>
    %31 = arith.addf %28, %30 : vector<8x96xf32>
    %32 = vector.shape_cast %31 : vector<8x96xf32> to vector<8x6x16xf32>
    %33 = tpu.transpose %32, [1, 0, 2] : vector<8x6x16xf32> -> vector<6x8x16xf32>
    %34 = vector.extract_strided_slice %33 {offsets = [0, 0, 0], sizes = [2, 8, 16], strides = [1, 1, 1]} : vector<6x8x16xf32> to vector<2x8x16xf32>
    %35 = arith.truncf %34 : vector<2x8x16xf32> to vector<2x8x16xbf16>
    %36 = vector.extract_strided_slice %33 {offsets = [2, 0, 0], sizes = [2, 8, 16], strides = [1, 1, 1]} : vector<6x8x16xf32> to vector<2x8x16xf32>
    %37 = arith.truncf %36 : vector<2x8x16xf32> to vector<2x8x16xbf16>
    %38 = vector.extract_strided_slice %33 {offsets = [4, 0, 0], sizes = [2, 8, 16], strides = [1, 1, 1]} : vector<6x8x16xf32> to vector<2x8x16xf32>
    %39 = arith.truncf %38 : vector<2x8x16xf32> to vector<2x8x16xbf16>
    "tpu.trace_start"() <{level = 10 : i32, message = "hqd,hkd->hqk"}> : () -> ()
    %cst_15 = arith.constant dense<0.000000e+00> : vector<2x8x8xf32>
    %40 = tpu.matmul %35, %37, %cst_15 {dimension_numbers = #tpu.dot_dimension_numbers<[2], [2], [1], [1], [0, 0, 0, 1, 1, 1], [0], [0]>} : vector<2x8x16xbf16>, vector<2x8x16xbf16>, vector<2x8x8xf32> -> vector<2x8x8xf32>
    "tpu.trace_stop"() : () -> ()
    %cst_16 = arith.constant 2.500000e-01 : f32
    %41 = vector.broadcast %cst_16 : f32 to vector<2x8x8xf32>
    %42 = arith.mulf %40, %41 : vector<2x8x8xf32>
    %cst_17 = arith.constant dense<0xFF800000> : vector<2x8xf32>
    %43 = vector.multi_reduction <maximumf>, %42, %cst_17 [2] : vector<2x8x8xf32> to vector<2x8xf32>
    %44 = vector.shape_cast %43 : vector<2x8xf32> to vector<2x8x1xf32>
    %45 = vector.broadcast %44 : vector<2x8x1xf32> to vector<2x8x8xf32>
    %46 = arith.subf %42, %45 : vector<2x8x8xf32>
    %47 = math.exp %46 : vector<2x8x8xf32>
    %cst_18 = arith.constant dense<0.000000e+00> : vector<2x8xf32>
    %48 = vector.multi_reduction <add>, %47, %cst_18 [2] : vector<2x8x8xf32> to vector<2x8xf32>
    %49 = vector.shape_cast %48 : vector<2x8xf32> to vector<2x8x1xf32>
    %50 = tpu.reciprocal %49 {approx = true} : vector<2x8x1xf32> -> vector<2x8x1xf32>
    %51 = vector.broadcast %50 : vector<2x8x1xf32> to vector<2x8x8xf32>
    %52 = arith.mulf %47, %51 : vector<2x8x8xf32>
    %53 = arith.truncf %52 : vector<2x8x8xf32> to vector<2x8x8xbf16>
    "tpu.trace_start"() <{level = 10 : i32, message = "hqk,hkd->hqd"}> : () -> ()
    %cst_19 = arith.constant dense<0.000000e+00> : vector<2x8x16xf32>
    %54 = tpu.matmul %53, %39, %cst_19 {dimension_numbers = #tpu.dot_dimension_numbers<[2], [1], [1], [2], [0, 0, 0, 1, 1, 2], [0], [0]>} : vector<2x8x8xbf16>, vector<2x8x16xbf16>, vector<2x8x16xf32> -> vector<2x8x16xf32>
    "tpu.trace_stop"() : () -> ()
    %55 = tpu.transpose %54, [1, 0, 2] : vector<2x8x16xf32> -> vector<8x2x16xf32>
    %56 = vector.shape_cast %55 : vector<8x2x16xf32> to vector<8x32xf32>
    %57 = arith.truncf %56 : vector<8x32xf32> to vector<8x32xbf16>
    %c0_20 = arith.constant 0 : index
    %c0_21 = arith.constant 0 : index
    %58 = vector.load %arg5[%c0_20, %c0_21] : memref<32x32xbf16, #tpu.memory_space<vmem>>, vector<32x32xbf16>
    %cst_22 = arith.constant dense<0.000000e+00> : vector<8x32xf32>
    %59 = tpu.matmul %57, %58, %cst_22 {dimension_numbers = #tpu.dot_dimension_numbers<[1], [0], [0], [1], [0, 0, 1, 1], [], []>} : vector<8x32xbf16>, vector<32x32xbf16>, vector<8x32xf32> -> vector<8x32xf32>
    %c0_23 = arith.constant 0 : index
    %c0_24 = arith.constant 0 : index
    %60 = vector.load %arg6[%c0_23, %c0_24] : memref<1x32xf32, #tpu.memory_space<vmem>>, vector<1x32xf32>
    %61 = vector.broadcast %60 : vector<1x32xf32> to vector<8x32xf32>
    %62 = arith.addf %59, %61 : vector<8x32xf32>
    %63 = arith.addf %62, %1 : vector<8x32xf32>
    %c0_25 = arith.constant 0 : index
    %c0_26 = arith.constant 0 : index
    %64 = vector.load %arg9[%c0_25, %c0_26] : memref<1x32xf32, #tpu.memory_space<vmem>>, vector<1x32xf32>
    %c0_27 = arith.constant 0 : index
    %c0_28 = arith.constant 0 : index
    %65 = vector.load %arg10[%c0_27, %c0_28] : memref<1x32xf32, #tpu.memory_space<vmem>>, vector<1x32xf32>
    %cst_29 = arith.constant dense<0.000000e+00> : vector<8xf32>
    %66 = vector.multi_reduction <add>, %63, %cst_29 [1] : vector<8x32xf32> to vector<8xf32>
    %67 = vector.shape_cast %66 : vector<8xf32> to vector<8x1xf32>
    %cst_30 = arith.constant 3.200000e+01 : f32
    %68 = vector.broadcast %cst_30 : f32 to vector<8x1xf32>
    %69 = arith.divf %67, %68 : vector<8x1xf32>
    %70 = vector.broadcast %69 : vector<8x1xf32> to vector<8x32xf32>
    %71 = arith.subf %63, %70 : vector<8x32xf32>
    %72 = arith.mulf %71, %71 : vector<8x32xf32>
    %cst_31 = arith.constant dense<0.000000e+00> : vector<8xf32>
    %73 = vector.multi_reduction <add>, %72, %cst_31 [1] : vector<8x32xf32> to vector<8xf32>
    %74 = vector.shape_cast %73 : vector<8xf32> to vector<8x1xf32>
    %cst_32 = arith.constant 3.200000e+01 : f32
    %75 = vector.broadcast %cst_32 : f32 to vector<8x1xf32>
    %76 = arith.divf %74, %75 : vector<8x1xf32>
    %77 = vector.broadcast %69 : vector<8x1xf32> to vector<8x32xf32>
    %78 = arith.subf %63, %77 : vector<8x32xf32>
    %cst_33 = arith.constant 9.99999974E-6 : f32
    %79 = vector.broadcast %cst_33 : f32 to vector<8x1xf32>
    %80 = arith.addf %76, %79 : vector<8x1xf32>
    %81 = math.rsqrt %80 : vector<8x1xf32>
    %82 = vector.broadcast %81 : vector<8x1xf32> to vector<8x32xf32>
    %83 = arith.mulf %78, %82 : vector<8x32xf32>
    %84 = vector.broadcast %64 : vector<1x32xf32> to vector<8x32xf32>
    %85 = arith.mulf %83, %84 : vector<8x32xf32>
    %86 = vector.broadcast %65 : vector<1x32xf32> to vector<8x32xf32>
    %87 = arith.addf %85, %86 : vector<8x32xf32>
    %88 = arith.truncf %87 : vector<8x32xf32> to vector<8x32xbf16>
    %c0_34 = arith.constant 0 : index
    %c0_35 = arith.constant 0 : index
    %89 = vector.load %arg11[%c0_34, %c0_35] : memref<32x64xbf16, #tpu.memory_space<vmem>>, vector<32x64xbf16>
    %cst_36 = arith.constant dense<0.000000e+00> : vector<8x64xf32>
    %90 = tpu.matmul %88, %89, %cst_36 {dimension_numbers = #tpu.dot_dimension_numbers<[1], [0], [0], [1], [0, 0, 1, 1], [], []>} : vector<8x32xbf16>, vector<32x64xbf16>, vector<8x64xf32> -> vector<8x64xf32>
    %c0_37 = arith.constant 0 : index
    %c0_38 = arith.constant 0 : index
    %91 = vector.load %arg12[%c0_37, %c0_38] : memref<1x64xf32, #tpu.memory_space<vmem>>, vector<1x64xf32>
    %92 = vector.broadcast %91 : vector<1x64xf32> to vector<8x64xf32>
    %93 = arith.addf %90, %92 : vector<8x64xf32>
    %cst_39 = arith.constant 5.000000e-01 : f32
    %94 = vector.broadcast %cst_39 : f32 to vector<8x64xf32>
    %95 = arith.mulf %94, %93 : vector<8x64xf32>
    %cst_40 = arith.constant 0.707106769 : f32
    %96 = vector.broadcast %cst_40 : f32 to vector<8x64xf32>
    %97 = arith.mulf %93, %96 : vector<8x64xf32>
    %98 = math.erf %97 : vector<8x64xf32>
    %cst_41 = arith.constant 1.000000e+00 : f32
    %99 = vector.broadcast %cst_41 : f32 to vector<8x64xf32>
    %100 = arith.addf %99, %98 : vector<8x64xf32>
    %101 = arith.mulf %95, %100 : vector<8x64xf32>
    %102 = arith.truncf %101 : vector<8x64xf32> to vector<8x64xbf16>
    %c0_42 = arith.constant 0 : index
    %c0_43 = arith.constant 0 : index
    %103 = vector.load %arg13[%c0_42, %c0_43] : memref<64x32xbf16, #tpu.memory_space<vmem>>, vector<64x32xbf16>
    %cst_44 = arith.constant dense<0.000000e+00> : vector<8x32xf32>
    %104 = tpu.matmul %102, %103, %cst_44 {dimension_numbers = #tpu.dot_dimension_numbers<[1], [0], [0], [1], [0, 0, 1, 1], [], []>} : vector<8x64xbf16>, vector<64x32xbf16>, vector<8x32xf32> -> vector<8x32xf32>
    %c0_45 = arith.constant 0 : index
    %c0_46 = arith.constant 0 : index
    %105 = vector.load %arg14[%c0_45, %c0_46] : memref<1x32xf32, #tpu.memory_space<vmem>>, vector<1x32xf32>
    %106 = vector.broadcast %105 : vector<1x32xf32> to vector<8x32xf32>
    %107 = arith.addf %104, %106 : vector<8x32xf32>
    %108 = arith.addf %107, %63 : vector<8x32xf32>
    %c0_47 = arith.constant 0 : index
    %c0_48 = arith.constant 0 : index
    %c0_49 = arith.constant 0 : index
    %109 = vector.load %arg15[%c0_47, %c0_48, %c0_49] : memref<1x8x32xf32, #tpu.memory_space<vmem>>, vector<1x8x32xf32>
    %110 = vector.shape_cast %109 : vector<1x8x32xf32> to vector<8x32xf32>
    %111 = vector.shape_cast %108 : vector<8x32xf32> to vector<1x8x32xf32>
    tpu.vector_store %arg15[%c0_47, %c0_48, %c0_49], %111 {strides = array<i32>} : memref<1x8x32xf32, #tpu.memory_space<vmem>>, vector<1x8x32xf32>,
    return
  }
  func.func @transform_0(%arg0: i32) -> (i32, i32, i32) {
    %c0_i32 = arith.constant 0 : i32
    %c0_i32_0 = arith.constant 0 : i32
    %c0_i32_1 = arith.constant 0 : i32
    return %arg0, %c0_i32, %c0_i32_0 : i32, i32, i32
  }
  func.func @transform_1(%arg0: i32) -> (i32, i32, i32) {
    %c0_i32 = arith.constant 0 : i32
    %c0_i32_0 = arith.constant 0 : i32
    %c0_i32_1 = arith.constant 0 : i32
    return %arg0, %c0_i32, %c0_i32_0 : i32, i32, i32
  }
  func.func @transform_2(%arg0: i32) -> (i32, i32) {
    %c0_i32 = arith.constant 0 : i32
    %c0_i32_0 = arith.constant 0 : i32
    %c0_i32_1 = arith.constant 0 : i32
    return %c0_i32, %c0_i32_0 : i32, i32
  }
  func.func @transform_3(%arg0: i32) -> (i32, i32) {
    %c0_i32 = arith.constant 0 : i32
    %c0_i32_0 = arith.constant 0 : i32
    %c0_i32_1 = arith.constant 0 : i32
    return %c0_i32, %c0_i32_0 : i32, i32
  }
  func.func @transform_4(%arg0: i32) -> (i32, i32) {
    %c0_i32 = arith.constant 0 : i32
    %c0_i32_0 = arith.constant 0 : i32
    %c0_i32_1 = arith.constant 0 : i32
    return %c0_i32, %c0_i32_0 : i32, i32
  }
  func.func @transform_5(%arg0: i32) -> (i32, i32) {
    %c0_i32 = arith.constant 0 : i32
    %c0_i32_0 = arith.constant 0 : i32
    %c0_i32_1 = arith.constant 0 : i32
    return %c0_i32, %c0_i32_0 : i32, i32
  }
  func.func @transform_6(%arg0: i32) -> (i32, i32) {
    %c0_i32 = arith.constant 0 : i32
    %c0_i32_0 = arith.constant 0 : i32
    %c0_i32_1 = arith.constant 0 : i32
    return %c0_i32, %c0_i32_0 : i32, i32
  }
  func.func @transform_7(%arg0: i32) -> (i32, i32) {
    %c0_i32 = arith.constant 0 : i32
    %c0_i32_0 = arith.constant 0 : i32
    %c0_i32_1 = arith.constant 0 : i32
    return %c0_i32, %c0_i32_0 : i32, i32
  }
  func.func @transform_8(%arg0: i32) -> (i32, i32) {
    %c0_i32 = arith.constant 0 : i32
    %c0_i32_0 = arith.constant 0 : i32
    %c0_i32_1 = arith.constant 0 : i32
    return %c0_i32, %c0_i32_0 : i32, i32
  }
  func.func @transform_9(%arg0: i32) -> (i32, i32) {
    %c0_i32 = arith.constant 0 : i32
    %c0_i32_0 = arith.constant 0 : i32
    %c0_i32_1 = arith.constant 0 : i32
    return %c0_i32, %c0_i32_0 : i32, i32
  }
  func.func @transform_10(%arg0: i32) -> (i32, i32) {
    %c0_i32 = arith.constant 0 : i32
    %c0_i32_0 = arith.constant 0 : i32
    %c0_i32_1 = arith.constant 0 : i32
    return %c0_i32, %c0_i32_0 : i32, i32
  }
  func.func @transform_11(%arg0: i32) -> (i32, i32) {
    %c0_i32 = arith.constant 0 : i32
    %c0_i32_0 = arith.constant 0 : i32
    %c0_i32_1 = arith.constant 0 : i32
    return %c0_i32, %c0_i32_0 : i32, i32
  }
  func.func @transform_12(%arg0: i32) -> (i32, i32) {
    %c0_i32 = arith.constant 0 : i32
    %c0_i32_0 = arith.constant 0 : i32
    %c0_i32_1 = arith.constant 0 : i32
    return %c0_i32, %c0_i32_0 : i32, i32
  }
  func.func @transform_13(%arg0: i32) -> (i32, i32) {
    %c0_i32 = arith.constant 0 : i32
    %c0_i32_0 = arith.constant 0 : i32
    %c0_i32_1 = arith.constant 0 : i32
    return %c0_i32, %c0_i32_0 : i32, i32
  }
  func.func @transform_14(%arg0: i32) -> (i32, i32, i32) {
    %c0_i32 = arith.constant 0 : i32
    %c0_i32_0 = arith.constant 0 : i32
    %c0_i32_1 = arith.constant 0 : i32
    return %arg0, %c0_i32, %c0_i32_0 : i32, i32, i32
  }
}

</mosaic_0001>

<bundles_post_ra>
// kernel: tpu_custom_call.1
= control target key start
LH: loop header
LB: loop body
LE: loop exit
PB: predicated region body
PF: predicated region fallthrough
CT: control target
= control target key end

     0   :  { %s2689_s0 = inlined_call_operand.vmem [shape: f32[2,8,32], index: 0, kind: input, shape index: {}]   ;;  %s2690_s1 = inlined_call_operand.vmem [shape: f32[2,1,8], index: 1, kind: input, shape index: {}]   ;;  %s2691_s2 = inlined_call_operand.vmem [shape: bf16[32,96], index: 2, kind: input, shape index: {}]   ;;  %s2692_s3 = inlined_call_operand.hbm [shape: f32[1,96], index: 3, kind: input, shape index: {}]   ;;  %s2693_s4 = inlined_call_operand.vmem [shape: bf16[32,32], index: 4, kind: input, shape index: {}]   ;;  %s2694_s5 = inlined_call_operand.hbm [shape: f32[1,32], index: 5, kind: input, shape index: {}]   ;;  %s2695_s6 = inlined_call_operand.hbm [shape: f32[1,32], index: 6, kind: input, shape index: {}]   ;;  %s2696_s7 = inlined_call_operand.hbm [shape: f32[1,32], index: 7, kind: input, shape index: {}]   ;;  %s2697_s8 = inlined_call_operand.hbm [shape: f32[1,32], index: 8, kind: input, shape index: {}]   ;;  %s2698_s9 = inlined_call_operand.hbm [shape: f32[1,32], index: 9, kind: input, shape index: {}]   ;;  %s2699_s10 = inlined_call_operand.vmem [shape: bf16[32,64], index: 10, kind: input, shape index: {}]   ;;  %s2700_s11 = inlined_call_operand.vmem [shape: f32[1,64], index: 11, kind: input, shape index: {}]   ;;  %s2701_s12 = inlined_call_operand.vmem [shape: bf16[64,32], index: 12, kind: input, shape index: {}]   ;;  %s2702_s13 = inlined_call_operand.vmem [shape: f32[1,32], index: 13, kind: input, shape index: {}]   ;;  %s2703_s14 = inlined_call_operand.hbm [shape: f32[2,8,32], index: 14, kind: output, shape index: {}]  }
   0x1   :  { %2714 = sst [smem:[#allocation25_spill]] %s2694_s5 }
   0x2   :  { %2715 = sst [smem:[#allocation26_spill]] %s2703_s14 }
   0x3   :  { %19 = vsyncpa [#allocation3], 0 }
   0x4   :  { %20 = vsyncpa [#allocation6], 0 }
   0x5   :  { %21 = vsyncpa [#allocation9], 0 }
   0x6   :  { %22 = vsyncpa [#allocation12], 0 }
   0x7   :  { %23 = vsyncpa [#allocation4], 0 }
   0x8   :  { %25 = vsyncpa [#allocation4 + $0x1], 0  ;;  %s2272_s28 = smov 0   ;;  %s2274_s29 = smov 0  }
   0x9   :  { %s2276_s30 = smov 0   ;;  %s2278_s15 = smov 0  }
   0xa LB: > { %2716 = sst [smem:[#allocation19_spill]] %s2166_s28  ;;  %s2293_s1 = sadd.s32 4294967295, %s2178_s15   ;;  %s2178_s15 = sphi %s2278_s15, %s2744_s15   ;;  %s2174_s30 = sphi %s2276_s30, %s2746_s30   ;;  %s2170_s29 = sphi %s2274_s29, %s2748_s29   ;;  %s2166_s28 = sphi %s2272_s28, %s2747_s28  }
   0xb   : > { %2717 = sst [smem:[#allocation20_spill]] %s2174_s30  ;;  %s1658_s16 = sadd.s32 4294967294, %s2178_s15  }
   0xc   : > { %2718 = sst [smem:[#allocation21_spill]] %s2178_s15  ;;  %s2297_s17 = sadd.s32 1, %s2178_s15  }
   0xd   : > { %2719 = sst [smem:[#allocation22_spill]] %s2297_s17  ;;  %s342_s18 = sadd.s32 1, %s2174_s30 }
   0xe   : > { %s339_s19 = ssub.s32 %s2178_s15, %s2297_s17  ;;  %p352_p0 = scmp.ne.s32.totalorder %s2174_s30, %s2170_s29 }
   0xf   : > { %p340_p1 = scmp.eq.s32.totalorder %s339_s19, 0  ;;  %p353_p2 = scmp.eq.s32.totalorder %s2293_s1, 1 }
  0x10   : > { %p358_p3 = scmp.ne.s32.totalorder %s2170_s29, %s2166_s28  ;;  %p359_p4 = scmp.eq.s32.totalorder %s1658_s16, 1 }
  0x11   : > { %s2308_s20 = scalar_select %p340_p1, %s2174_s30, %s342_s18  }
  0x12   : > { %p2310_p5 = por %p353_p2, %p352_p0  ;;  %p2314_p6 = por %p359_p4, %p358_p3 }
  0x13   : > { %2720 = sst [smem:[#allocation23_spill]] %s2308_s20  ;;  %p1659_p7 = scmp.ge.s32.totalorder %s2178_s15, 1 }
  0x14   : > { %s2721_s21 = scalar_select %p2310_p5, 1, 0 }
  0x15   : > { %s2722_s22 = scalar_select %p2314_p6, 1, 0 }
  0x16   : > { %p366_p8 = scmp.lt.s32.totalorder %s2178_s15, 3  ;;  %p2709_p9 = scmp.eq.s32.totalorder %s2293_s1, 0 }
  0x17   : > { %2723 = sst [smem:[#allocation24_spill]] %s2722_s22  ;;  %s2180_s24 = smov [#allocation5]  }
  0x18   : > { %p2321_p10 = pnand %p1659_p7, %p366_p8  ;;  %s396_s25 = sshll.u32 %s2180_s24, 4  ;;  %s397_s25 = int_to_ptr.vmem [resolvable:$true] %s396_s25 }
  0x19   : > { %s2181_s26 = smov [#allocation8]   ;;  %s2182_s18 = smov [#allocation2]  }
  0x1a   : > { %s2724_s23 = scalar_select %p2321_p10, 1, 0 }
  0x1b   : > { %p1824_p11 = pneg %p2321_p10  ;;  %s418_s27 = sshll.u32 %s2181_s26, 4  ;;  %s2333_s27 = int_to_ptr.vmem [resolvable:$true] %s418_s27 }
  0x1c   : > { %s382_s19 = sshll.u32 %s2182_s18, 4  ;;  %s2726_s5 = sld [smem:[#allocation25_spill]]  ;;  %s2335_s19 = int_to_ptr.vmem [resolvable:$true] %s382_s19 }
  0x1d   : > { %p2329_p12 = pnand %p2709_p9, %p1824_p11 }
  0x1f   : > { %p2345_p0 = pneg %p2329_p12 }
  0x22   : > { %s1932_s24 = scalar_lea.hbm %s2726_s5, 16 }
  0x23   : > { %p1933_p13 = scmp.ne.s32.totalorder %s2726_s5, %s1932_s24  ;;  %p1939_p3 = scmp.lt.u32.totalorder %s1932_s24, %s2726_s5 }
  0x25   : > { %p1935_p1 = pnand %p2345_p0, %p1933_p13 }
  0x27   : > { %p1936_p2 = pneg %p1935_p1 }
  0x29   : > { %p1941_p4 = pnand %p1939_p3, %p1936_p2 }
  0x2b   : > { %1944 = shalt.err (!%p1941_p4)
}
  0x2c   : > { %s1945_s30 = scalar_lea.vmem %s397_s25, 16  ;;  %s1952_s17 = scalar_lea.vmem %s397_s25, 32 }
  0x2d   : > { %p1946_p7 = scmp.ne.s32.totalorder %s397_s25, %s1945_s30  ;;  %p1953_p9 = scmp.lt.s32.totalorder %s397_s25, %s397_s25 }
  0x2e   : > { %p1954_p6 = scmp.lt.s32.totalorder %s1952_s17, %s1945_s30 }
  0x2f   : > { %p1948_p8 = pnand %p1946_p7, %p2345_p0 }
  0x30   : > { %p1955_p5 = por %p1954_p6, %p1953_p9 }
  0x31   : > { %p1949_p11 = pneg %p1948_p8 }
  0x33   : > { %p1956_p10 = pnand %p1955_p5, %p1949_p11 }
  0x35   : > { %1959 = shalt.err (!%p1956_p10)
}
  0x36   : > { %1830 = dma.hbm_to_vmem [thread:$0]  (!%p2329_p12), %s2726_s5, 16, %s397_s25, [#allocation6]  }
  0x37   : > { %s1960_s18 = scalar_lea.hbm %s2696_s7, 16 }
  0x38   : > { %p1961_p13 = scmp.ne.s32.totalorder %s2696_s7, %s1960_s18  ;;  %p1967_p5 = scmp.lt.u32.totalorder %s1960_s18, %s2696_s7 }
  0x3a   : > { %p1963_p1 = pnand %p1961_p13, %p2345_p0 }
  0x3c   : > { %p1964_p6 = pneg %p1963_p1 }
  0x3e   : > { %p1969_p9 = pnand %p1967_p5, %p1964_p6 }
  0x40   : > { %1972 = shalt.err (!%p1969_p9)
}
  0x41   : > { %s1973_s25 = scalar_lea.vmem %s2333_s27, 16  ;;  %s1980_s14 = scalar_lea.vmem %s2333_s27, 32 }
  0x42   : > { %p1974_p10 = scmp.ne.s32.totalorder %s2333_s27, %s1973_s25  ;;  %p1981_p4 = scmp.lt.s32.totalorder %s2333_s27, %s2333_s27 }
  0x43   : > { %p1982_p7 = scmp.lt.s32.totalorder %s1980_s14, %s1973_s25 }
  0x44   : > { %p1976_p2 = pnand %p1974_p10, %p2345_p0 }
  0x45   : > { %p1983_p8 = por %p1982_p7, %p1981_p4 }
  0x46   : > { %p1977_p3 = pneg %p1976_p2 }
  0x48   : > { %p1984_p11 = pnand %p1983_p8, %p1977_p3 }
  0x4a   : > { %1987 = shalt.err (!%p1984_p11)
}
  0x4b   : > { %1836 = dma.hbm_to_vmem [thread:$0]  (!%p2329_p12), %s2696_s7, 16, %s2333_s27, [#allocation9]  }
  0x4c   : > { %s1988_s24 = scalar_lea.hbm %s2692_s3, 16 }
  0x4d   : > { %p1989_p13 = scmp.ne.s32.totalorder %s2692_s3, %s1988_s24  ;;  %p1995_p5 = scmp.lt.u32.totalorder %s1988_s24, %s2692_s3 }
  0x4f   : > { %p1991_p1 = pnand %p1989_p13, %p2345_p0 }
  0x51   : > { %p1992_p6 = pneg %p1991_p1 }
  0x53   : > { %p1997_p9 = pnand %p1995_p5, %p1992_p6 }
  0x55   : > { %2000 = shalt.err (!%p1997_p9)
}
  0x56   : > { %s2001_s27 = scalar_lea.vmem %s2335_s19, 16  ;;  %s2008_s14 = scalar_lea.vmem %s2335_s19, 32 }
  0x57   : > { %p2002_p10 = scmp.ne.s32.totalorder %s2335_s19, %s2001_s27  ;;  %p2009_p4 = scmp.lt.s32.totalorder %s2335_s19, %s2335_s19 }
  0x58   : > { %p2010_p7 = scmp.lt.s32.totalorder %s2008_s14, %s2001_s27 }
  0x59   : > { %p2004_p2 = pnand %p2002_p10, %p2345_p0 }
  0x5a   : > { %p2011_p8 = por %p2010_p7, %p2009_p4 }
  0x5b   : > { %p2005_p3 = pneg %p2004_p2 }
  0x5d   : > { %p2012_p11 = pnand %p2011_p8, %p2005_p3 }
  0x5f   : > { %2015 = shalt.err (!%p2012_p11)
}
  0x60   : > { %1827 = dma.hbm_to_vmem [thread:$0]  (!%p2329_p12), %s2692_s3, 16, %s2335_s19, [#allocation3]  }
  0x61   : > { %s2183_s22 = smov [#allocation7]   ;;  %s2184_s24 = smov [#allocation10]  }
  0x62   : > { %s407_s28 = sshll.u32 %s2183_s22, 4  ;;  %s429_s18 = sshll.u32 %s2184_s24, 4  ;;  %s408_s28 = int_to_ptr.vmem [resolvable:$true] %s407_s28  ;;  %s430_s18 = int_to_ptr.vmem [resolvable:$true] %s429_s18 }
  0x63   : > { %s2016_s25 = scalar_lea.hbm %s2695_s6, 16 }
  0x64   : > { %p2017_p13 = scmp.ne.s32.totalorder %s2695_s6, %s2016_s25  ;;  %p2023_p5 = scmp.lt.u32.totalorder %s2016_s25, %s2695_s6 }
  0x66   : > { %p2019_p1 = pnand %p2017_p13, %p2345_p0 }
  0x68   : > { %p2020_p6 = pneg %p2019_p1 }
  0x6a   : > { %p2025_p9 = pnand %p2023_p5, %p2020_p6 }
  0x6c   : > { %2028 = shalt.err (!%p2025_p9)
}
  0x6d   : > { %s2029_s19 = scalar_lea.vmem %s408_s28, 16  ;;  %s2036_s20 = scalar_lea.vmem %s408_s28, 32 }
  0x6e   : > { %p2030_p10 = scmp.ne.s32.totalorder %s408_s28, %s2029_s19  ;;  %p2037_p4 = scmp.lt.s32.totalorder %s408_s28, %s408_s28 }
  0x6f   : > { %p2038_p7 = scmp.lt.s32.totalorder %s2036_s20, %s2029_s19 }
  0x70   : > { %p2032_p2 = pnand %p2030_p10, %p2345_p0 }
  0x71   : > { %p2039_p8 = por %p2038_p7, %p2037_p4 }
  0x72   : > { %p2033_p3 = pneg %p2032_p2 }
  0x74   : > { %p2040_p11 = pnand %p2039_p8, %p2033_p3 }
  0x76   : > { %2043 = shalt.err (!%p2040_p11)
}
  0x77   : > { %1833 = dma.hbm_to_vmem [thread:$0]  (!%p2329_p12), %s2695_s6, 16, %s408_s28, [#allocation6]  }
  0x78   : > { %s2044_s17 = scalar_lea.hbm %s2697_s8, 16 }
  0x79   : > { %p2045_p13 = scmp.ne.s32.totalorder %s2697_s8, %s2044_s17  ;;  %p2051_p5 = scmp.lt.u32.totalorder %s2044_s17, %s2697_s8 }
  0x7b   : > { %p2047_p1 = pnand %p2045_p13, %p2345_p0 }
  0x7d   : > { %p2048_p6 = pneg %p2047_p1 }
  0x7f   : > { %p2053_p9 = pnand %p2051_p5, %p2048_p6 }
  0x81   : > { %2056 = shalt.err (!%p2053_p9)
}
  0x82   : > { %s2057_s19 = scalar_lea.vmem %s430_s18, 16  ;;  %s2064_s28 = scalar_lea.vmem %s430_s18, 32 }
  0x83   : > { %p2058_p10 = scmp.ne.s32.totalorder %s430_s18, %s2057_s19  ;;  %p2065_p4 = scmp.lt.s32.totalorder %s430_s18, %s430_s18 }
  0x84   : > { %p2066_p7 = scmp.lt.s32.totalorder %s2064_s28, %s2057_s19 }
  0x85   : > { %p2060_p2 = pnand %p2058_p10, %p2345_p0 }
  0x86   : > { %p2067_p8 = por %p2066_p7, %p2065_p4 }
  0x87   : > { %p2061_p3 = pneg %p2060_p2 }
  0x89   : > { %p2068_p11 = pnand %p2067_p8, %p2061_p3 }
  0x8b   : > { %2071 = shalt.err (!%p2068_p11)
}
  0x8c   : > { %1839 = dma.hbm_to_vmem [thread:$0]  (!%p2329_p12), %s2697_s8, 16, %s430_s18, [#allocation9]  }
  0x8d   : > { %s2185_s24 = smov [#allocation11]   ;;  %s2072_s25 = scalar_lea.hbm %s2698_s9, 16 }
  0x8e   : > { %s440_s5 = sshll.u32 %s2185_s24, 4  ;;  %p2073_p13 = scmp.ne.s32.totalorder %s2698_s9, %s2072_s25  ;;  %s441_s5 = int_to_ptr.vmem [resolvable:$true] %s440_s5 }
  0x8f   : > { %p2079_p5 = scmp.lt.u32.totalorder %s2072_s25, %s2698_s9 }
  0x90   : > { %p2075_p1 = pnand %p2073_p13, %p2345_p0 }
  0x92   : > { %p2076_p6 = pneg %p2075_p1 }
  0x94   : > { %p2081_p9 = pnand %p2079_p5, %p2076_p6 }
  0x96   : > { %2084 = shalt.err (!%p2081_p9)
}
  0x97   : > { %s2085_s18 = scalar_lea.vmem %s441_s5, 16  ;;  %s2092_s28 = scalar_lea.vmem %s441_s5, 32 }
  0x98   : > { %p2086_p10 = scmp.ne.s32.totalorder %s441_s5, %s2085_s18  ;;  %p2093_p4 = scmp.lt.s32.totalorder %s441_s5, %s441_s5 }
  0x99   : > { %p2094_p7 = scmp.lt.s32.totalorder %s2092_s28, %s2085_s18 }
  0x9a   : > { %p2088_p2 = pnand %p2086_p10, %p2345_p0 }
  0x9b   : > { %p2095_p8 = por %p2094_p7, %p2093_p4 }
  0x9c   : > { %p2089_p3 = pneg %p2088_p2 }
  0x9e   : > { %p2096_p11 = pnand %p2095_p8, %p2089_p3 }
  0xa0   : > { %2099 = shalt.err (!%p2096_p11)
}
  0xa1   : > { %1842 = dma.hbm_to_vmem [thread:$0]  (!%p2329_p12), %s2698_s9, 16, %s441_s5, [#allocation12]  }
  0xa2   : > { %p2728_p13 = scmp.ne.s32.totalorder %s2724_s23, 0 }
  0xa3   : > { %p2729_p1 = scmp.eq.s32.totalorder (!%p2728_p13), %s2293_s1, 0 }
  0xa4   : > { %478 = sbr.rel (%p2728_p13) target bundleno = 2754 (0xac2), region = 76 }
  0xab   : > { %2145 = dma.done.wait (%p2729_p1), [#allocation3], 16   ;;  %p2730_p0 = pmov %p2729_p1 }
  0xad   : > { %2147 = vsyncadd (%p2730_p0), [#allocation3], 4294967280  ;;  %p2731_p6 = pmov %p2730_p0 }
  0xae   : > { %p2732_p5 = pmov %p2730_p0 }
  0xaf   : > { %2149 = dma.done.wait (%p2731_p6), [#allocation6], 32  }
  0xb0   : > { %2151 = vsyncadd (%p2732_p5), [#allocation6], 4294967264  ;;  %p2733_p9 = pmov %p2730_p0 }
  0xb1   : > { %p2734_p12 = pmov %p2730_p0 }
  0xb2   : > { %2153 = dma.done.wait (%p2733_p9), [#allocation9], 32  }
  0xb3   : > { %2155 = vsyncadd (%p2734_p12), [#allocation9], 4294967264  ;;  %p2735_p10 = pmov %p2730_p0 }
  0xb4   : > { %p2736_p2 = pmov %p2730_p0 }
  0xb5   : > { %2157 = dma.done.wait (%p2735_p10), [#allocation12], 16  }
  0xb6   : > { %2159 = vsyncadd (%p2736_p2), [#allocation12], 4294967280  ;;  %p546_p3 = scmp.lt.s32.totalorder %s2293_s1, 1  ;;  %vm557_vm0 = vcmask 261120   ;;  %v1908_v7 = vld [vmem:[%s2691_s2] sm:$0xff]   ;;  %v2186_v8 = vmov 0.0   ;;  %v674_v28 = vlaneseq }
  0xb7   : > { %1738 = vmatprep.subr.bf16.mxu0 %v2186_v8  ;;  %vm2187_vm1 = vmmov 0   ;;  %v1909_v9 = vld [vmem:[%s2691_s2 + $0x8] sm:$0xff]   ;;  %1746 = vmatprep.subr.bf16.mxu1 %v2186_v8  ;;  %v1676_v14 = vld [vmem:[#allocation7] ss:$0 sm:$0xff]  ;;  %v1677_v16 = vld [vmem:[#allocation8] ss:$0 sm:$0xff] }
  0xb8   : > { %s547_s23 = scalar_select %p546_p3, %s2293_s1, 1  ;;  %1742 = vmatprep.mubr.msk.bf16.mxu0 %vm2187_vm1, %v2186_v8  ;;  %1739 = vmatpush3.bf16.msra.mxu0 %v1908_v7  ;;  %v1678_v20 = vld [vmem:[#allocation2] ss:$0 sm:$0xff]  ;;  %v2191_v26 = vmov 1983009808   ;;  %v675_v32 = vshrl.u32 %v674_v28, 7 }
  0xb9   : > { %1740 = vmatprep.subr.bf16.mxu0 %v2186_v8  ;;  %1748 = vmatprep.mubr.msk.bf16.mxu1 %vm2187_vm1, %v2186_v8  ;;  %s2188_s14 = smov 80   ;;  %s2189_s15 = smov 112   ;;  %v672_v27 = vunpack.c.l.s4 %v2191_v26  ;;  %v2192_v29 = vmov 1934713408   ;;  %vm927_vm2 = vcmask 130048   ;;  %vm1022_vm3 = vcmask 64512  }
  0xba   : > { %s1675_s16 = sshll.u32 %s547_s23, 3  ;;  %s2190_s19 = smov 96   ;;  %v734_v30 = vunpack.c.l.s4 %v2192_v29  ;;  %vm1050_vm4 = vcmask 1043456   ;;  %vm1470_vm5 = vcmask 523264  }
  0xbb   : > { %s549_s5 = scalar_lea.vmem %s2689_s0, %s1675_s16  ;;  %v673_v31 = vunpack.c.0.s8 %v672_v27  ;;  %s2193_s18 = smov 48  }
  0xbc   : > { %v2486_v0 = vld [vmem:[%s549_s5] sm:$0xff]  ;;  %1741 = vmatpush3.bf16.msra.mxu0 %v1909_v9  ;;  %v735_v35 = vunpack.c.0.s8 %v734_v30  ;;  %s2194_s28 = smov 64   ;;  %s2195_s26 = smov 16  }
  0xbd   : > { %v558_v1 = vsel %vm557_vm0, %v2486_v0, 0.0  ;;  %1752 = vmatprep.subr.bf16.mxu0 %v2186_v8  ;;  %v2514_v36 = vsub.s32 %v673_v31, %v675_v32  ;;  %s543_s16 = sand.u32 1, %s2170_s29   ;;  %s1713_s30 = sshll.u32 %s2293_s1, 7 }
  0xbe   : > { %559 = vadd.xlane.f32.xlu0 %v558_v1  ;;  %v2518_v42 = vsub.s32 %v735_v35, %v675_v32  ;;  %s1517_s1 = scalar_lea.sflag [#allocation4], %s543_s16  ;;  %p2739_p7 = scmp.ne.s32.totalorder %s2721_s21, 0 }
  0xbf   : > { %s2196_s20 = smov [#allocation13]  }
  0xc0   : > { %s2104_s22 = sshll.u32 %s2196_s20, 4  ;;  %s2105_s22 = int_to_ptr.vmem [resolvable:$false] %s2104_s22 }
  0xc1   : > { %s2106_s23 = scalar_lea.vmem %s2105_s22, 256 }
 0x14b   : > { %v560_v2 = vpop.xlane.xlu0 %559 }
 0x14c   : > { %v562_v3 = vmul.f32 0.03125, %v560_v2 }
 0x14e   : > { %v563_v4 = vsub.f32 %v2486_v0, %v562_v3 }
 0x150   : > { %v564_v5 = vmul.f32 %v563_v4, %v563_v4 }
 0x152   : > { %v565_v6 = vsel %vm557_vm0, %v564_v5, 0.0 }
 0x153   : > { %566 = vadd.xlane.f32.xlu0 %v565_v6 }
 0x1e0   : > { %v567_v10 = vpop.xlane.xlu0 %566 }
 0x1e1   : > { %v568_v11 = vmul.f32 0.03125, %v567_v10 }
 0x1e3   : > { %v569_v12 = vadd.f32 1e-05, %v568_v11 }
 0x1e5   : > { %1918 = vrsqrt.f32 %v569_v12 }
 0x1ef   : > { %v1919_v13 = vpop.eup %1918 }
 0x1f0   : > { %v571_v15 = vmul.f32 %v1919_v13, %v563_v4 }
 0x1f2   : > { %v578_v17 = vmul.f32 %v1676_v14, %v571_v15 }
 0x1f4   : > { %v585_v18 = vadd.f32 %v1677_v16, %v578_v17 }
 0x1f6   : > { %v586_v19 = vpack.c.bf16 %v585_v18, %v585_v18 }
 0x1f8   : > { %1743 = vmatmul.mubr.msk.bf16.vlgmr.msra.gmra.mrb[0].mxu0 %vm557_vm0, %v586_v19 }
 0x1f9   : > { %1754 = vmatprep.mubr.msk.bf16.mxu0 %vm2187_vm1, %v2186_v8 }
 0x2cb   : > { %v647_v21 = vpop.f32.mrb[0].mxu0 }
 0x2cc   : > { %v2509_v22 = vadd.f32 %v1678_v20, %v647_v21  ;;  %v1744_v23 = vpop.f32.mrb[1].mxu0 }
 0x2cd   : > { %v650_v24 = vpop.f32.mrb[2].mxu0 }
 0x2ce   : > { %660 = vrot.lane.b32.xlu0 %v2509_v22, %s2188_s14  ;;  %654 = vrot.lane.b32.xlu1 %v2509_v22, %s2189_s15  ;;  %v1745_v25 = vpop.f32.mrb[3].mxu0  ;;  %s2737_s15 = sld [smem:[#allocation26_spill]] }
 0x2d2   : > { %657 = vrot.lane.b32.xlu1 %v2509_v22, %s2190_s19 }
 0x2d4   : > { %s2738_s19 = smov %s2737_s15 }
 0x340   : > { %v661_v33 = vpop.permute.xlu0 %660  ;;  %v655_v34 = vpop.permute.xlu1 %654 }
 0x341   : > { %v685_v37 = vcombine.low %v655_v34, %v661_v33  ;;  %v686_v38 = vcombine.high %v655_v34, %v661_v33 }
 0x343   : > { %v693_v43 = vrot.slane %v685_v37, %v2514_v36  ;;  %v700_v44 = vrot.slane %v686_v38, %v2514_v36 }
 0x344   : > { %v658_v39 = vpop.permute.xlu1 %657 }
 0x345   : > { %v669_v40 = vcombine.low %v2509_v22, %v658_v39  ;;  %v670_v41 = vcombine.high %v2509_v22, %v658_v39 }
 0x347   : > { %v677_v45 = vrot.slane %v669_v40, %v2514_v36  ;;  %v684_v46 = vrot.slane %v670_v41, %v2514_v36 }
 0x349   : > { %v731_v47 = vcombine.low %v677_v45, %v693_v43  ;;  %v732_v48 = vcombine.high %v677_v45, %v693_v43  ;;  %v747_v49 = vcombine.low %v684_v46, %v700_v44  ;;  %v748_v50 = vcombine.high %v684_v46, %v700_v44 }
 0x34b   : > { %v739_v51 = vrot.slane %v731_v47, %v2518_v42  ;;  %v746_v52 = vrot.slane %v732_v48, %v2518_v42  ;;  %v755_v53 = vrot.slane %v747_v49, %v2518_v42  ;;  %v762_v54 = vrot.slane %v748_v50, %v2518_v42 }
 0x34d   : > { %v1682_v55 = vcombine.low %v739_v51, %v746_v52  ;;  %v1684_v56 = vcombine.high %v739_v51, %v746_v52  ;;  %v1686_v57 = vcombine.low %v755_v53, %v762_v54  ;;  %v1688_v58 = vcombine.high %v755_v53, %v762_v54 }
 0x34f   : > { %v811_v59 = vrot.slane %v1682_v55, %v2514_v36  ;;  %v827_v60 = vrot.slane %v1684_v56, %v2514_v36  ;;  %v843_v61 = vrot.slane %v1686_v57, %v2514_v36  ;;  %v859_v62 = vrot.slane %v1688_v58, %v2514_v36 }
 0x351   : > { %v868_v63 = vcombine.high %v811_v59, %v827_v60  ;;  %v892_v1 = vcombine.high %v843_v61, %v859_v62  ;;  %v867_v2 = vcombine.low %v811_v59, %v827_v60  ;;  %v891_v4 = vcombine.low %v843_v61, %v859_v62 }
 0x353   : > { %v882_v3 = vrot.slane %v868_v63, %v2518_v42  ;;  %v906_v5 = vrot.slane %v892_v1, %v2518_v42  ;;  %v875_v11 = vrot.slane %v867_v2, %v2518_v42  ;;  %v899_v12 = vrot.slane %v891_v4, %v2518_v42 }
 0x355   : > { %v917_v6 = vcombine.low %v882_v3, %v906_v5  ;;  %v918_v7 = vcombine.high %v882_v3, %v906_v5  ;;  %v915_v15 = vcombine.low %v875_v11, %v899_v12  ;;  %v916_v16 = vcombine.high %v875_v11, %v899_v12 }
 0x357   : > { %v923_v9 = vpack.c.bf16 %v917_v6, %v917_v6  ;;  %v924_v10 = vpack.c.bf16 %v918_v7, %v918_v7  ;;  %v921_v17 = vpack.c.bf16 %v915_v15, %v915_v15  ;;  %v922_v18 = vpack.c.bf16 %v916_v16, %v916_v16 }
 0x359   : > { %v932_v13 = vsel %vm927_vm2, %v923_v9, 0  ;;  %v978_v14 = vsel %vm927_vm2, %v924_v10, 0 }
 0x35a   : > { %1747 = vmatpush3.bf16.xpose.msra.mxu1 %v932_v13  ;;  %1753 = vmatpush3.bf16.xpose.msra.mxu0 %v978_v14 }
 0x35b   : > { %1758 = vmatprep.subr.bf16.mxu1 %v2186_v8  ;;  %1764 = vmatprep.subr.bf16.mxu0 %v2186_v8 }
 0x361   : > { %1749 = vmatmul.mubr.msk.bf16.vlgmr.msra.gmra.mrb[0].mxu1 %vm927_vm2, %v921_v17  ;;  %1755 = vmatmul.mubr.msk.bf16.vlgmr.msra.gmra.mrb[4].mxu0 %vm927_vm2, %v922_v18 }
 0x362   : > { %1760 = vmatprep.mubr.msk.bf16.mxu1 %vm2187_vm1, %v2186_v8  ;;  %1766 = vmatprep.mubr.msk.bf16.mxu0 %vm2187_vm1, %v2186_v8 }
 0x434   : > { %v968_v19 = vpop.f32.mrb[0].mxu1  ;;  %v1014_v20 = vpop.f32.mrb[4].mxu0 }
 0x435   : > { %v1020_v21 = vmul.f32 0.25, %v968_v19  ;;  %v1021_v23 = vmul.f32 0.25, %v1014_v20  ;;  %v1750_v24 = vpop.f32.mrb[1].mxu1  ;;  %v1756_v25 = vpop.f32.mrb[5].mxu0 }
 0x436   : > { %v971_v26 = vpop.f32.mrb[2].mxu1  ;;  %v1017_v27 = vpop.f32.mrb[6].mxu0  ;;  %v1910_v24 = vld [vmem:[%s2693_s4] sm:$0xff]  }
 0x437   : > { %v1751_v28 = vpop.f32.mrb[3].mxu1  ;;  %v1757_v29 = vpop.f32.mrb[7].mxu0  ;;  %v1023_v30 = vsel %vm1022_vm3, %v1020_v21, -inf  ;;  %v1026_v31 = vsel %vm1022_vm3, %v1021_v23, -inf }
 0x438   : > { %1024 = vmax.xlane.f32.xlu1 %v1023_v30  ;;  %1027 = vmax.xlane.f32.xlu0 %v1026_v31 }
 0x44e   : > { %666 = vrot.lane.b32.xlu0 %v2509_v22, %s2193_s18  ;;  %s2646_s18 = scalar_lea.hbm %s2737_s15, %s1713_s30 }
 0x4c5   : > { %v1025_v32 = vpop.xlane.xlu1 %1024  ;;  %v1028_v33 = vpop.xlane.xlu0 %1027 }
 0x4c6   : > { %v1029_v34 = vsub.f32 %v1020_v21, %v1025_v32  ;;  %v1030_v35 = vsub.f32 %v1021_v23, %v1028_v33 }
 0x4c8   : > { %v1031_v37 = vmul.f32 1.442695, %v1029_v34  ;;  %v1033_v38 = vmul.f32 1.442695, %v1030_v35 }
 0x4c9   : > { %v667_v45 = vpop.permute.xlu0 %666 }
 0x4ca   : > { %1920 = vpow2.f32 %v1031_v37  ;;  %v716_v47 = vcombine.high %v667_v45, %v2186_v8  ;;  %v723_v49 = vrot.slane %v667_v45, %v2514_v36 }
 0x4cb   : > { %1922 = vpow2.f32 %v1033_v38 }
 0x4cc   : > { %v730_v52 = vrot.slane %v716_v47, %v2514_v36  ;;  %v1911_v47 = vld [vmem:[%s2693_s4 + $0x8] sm:$0xff]  }
 0x4d4   : > { %v1921_v39 = vpop.eup %1920 }
 0x4d5   : > { %v1035_v40 = vsel %vm1022_vm3, %v1921_v39, 0.0  ;;  %v1923_v41 = vpop.eup %1922 }
 0x4d6   : > { %1036 = vadd.xlane.f32.xlu1 %v1035_v40  ;;  %v1038_v43 = vsel %vm1022_vm3, %v1923_v41, 0.0 }
 0x4da   : > { %1039 = vadd.xlane.f32.xlu1 %v1038_v43 }
 0x4eb   : > { %663 = vrot.lane.b32.xlu1 %v2509_v22, %s2194_s28 }
 0x563   : > { %v1037_v44 = vpop.xlane.xlu1 %1036 }
 0x564   : > { %1924 = vrcp.f32 %v1037_v44 }
 0x567   : > { %v1040_v46 = vpop.xlane.xlu1 %1039 }
 0x568   : > { %1926 = vrcp.f32 %v1040_v46 }
 0x56b   : > { %v664_v48 = vpop.permute.xlu1 %663 }
 0x56c   : > { %v701_v50 = vcombine.high %v664_v48, %v2186_v8  ;;  %v708_v51 = vrot.slane %v664_v48, %v2514_v36 }
 0x56e   : > { %v715_v53 = vrot.slane %v701_v50, %v2514_v36  ;;  %v763_v54 = vcombine.low %v708_v51, %v723_v49  ;;  %v764_v55 = vcombine.high %v708_v51, %v723_v49  ;;  %v1925_v9 = vpop.eup %1924 }
 0x56f   : > { %v1043_v15 = vmul.f32 %v1925_v9, %v1921_v39 }
 0x570   : > { %v771_v22 = vrot.slane %v763_v54, %v2518_v42  ;;  %v778_v56 = vrot.slane %v764_v55, %v2518_v42  ;;  %v779_v57 = vcombine.low %v715_v53, %v730_v52  ;;  %v780_v58 = vcombine.high %v715_v53, %v730_v52 }
 0x571   : > { %v1045_v21 = vpack.c.bf16 %v1043_v15, %v1043_v15  ;;  %v1912_v15 = vld [vmem:[%s2699_s10] sm:$0xff]  }
 0x572   : > { %v787_v59 = vrot.slane %v779_v57, %v2518_v42  ;;  %v794_v60 = vrot.slane %v780_v58, %v2518_v42  ;;  %v1683_v61 = vcombine.low %v771_v22, %v778_v56  ;;  %v1685_v62 = vcombine.high %v771_v22, %v778_v56  ;;  %v1927_v12 = vpop.eup %1926 }
 0x573   : > { %v1044_v16 = vmul.f32 %v1927_v12, %v1923_v41 }
 0x574   : > { %v818_v63 = vrot.slane %v1683_v61, %v2514_v36  ;;  %v834_v1 = vrot.slane %v1685_v62, %v2514_v36  ;;  %v1687_v2 = vcombine.low %v787_v59, %v794_v60  ;;  %v1689_v3 = vcombine.high %v787_v59, %v794_v60 }
 0x575   : > { %v1046_v23 = vpack.c.bf16 %v1044_v16, %v1044_v16 }
 0x576   : > { %v850_v4 = vrot.slane %v1687_v2, %v2514_v36  ;;  %v866_v5 = vrot.slane %v1689_v3, %v2514_v36  ;;  %v883_v6 = vcombine.low %v818_v63, %v834_v1 }
 0x578   : > { %v907_v7 = vcombine.low %v850_v4, %v866_v5  ;;  %v890_v10 = vrot.slane %v883_v6, %v2518_v42 }
 0x57a   : > { %v914_v11 = vrot.slane %v907_v7, %v2518_v42 }
 0x57c   : > { %v919_v13 = vcombine.low %v890_v10, %v914_v11  ;;  %v920_v14 = vcombine.high %v890_v10, %v914_v11 }
 0x57e   : > { %v925_v17 = vpack.c.bf16 %v919_v13, %v919_v13  ;;  %v926_v18 = vpack.c.bf16 %v920_v14, %v920_v14 }
 0x580   : > { %v1052_v19 = vsel %vm1050_vm4, %v925_v17, 0  ;;  %v1098_v20 = vsel %vm1050_vm4, %v926_v18, 0 }
 0x581   : > { %1759 = vmatpush3.bf16.msra.mxu1 %v1052_v19  ;;  %1765 = vmatpush3.bf16.msra.mxu0 %v1098_v20  ;;  %v1700_v20 = vld [vmem:[#allocation10] ss:$0 sm:$0xff] }
 0x582   : > { %1770 = vmatprep.subr.bf16.mxu1 %v2186_v8  ;;  %1778 = vmatprep.subr.bf16.mxu0 %v2186_v8 }
 0x584   : > { %1761 = vmatmul.mubr.msk.bf16.vlgmr.msra.gmra.mrb[4].mxu1 %vm1022_vm3, %v1045_v21  ;;  %1767 = vmatmul.mubr.msk.bf16.vlgmr.msra.gmra.mrb[8].mxu0 %vm1022_vm3, %v1046_v23  ;;  %v1701_v23 = vld [vmem:[#allocation11] ss:$0 sm:$0xff] }
 0x585   : > { %1774 = vmatprep.mubr.msk.bf16.mxu1 %vm2187_vm1, %v2186_v8  ;;  %1782 = vmatprep.mubr.msk.bf16.mxu0 %vm2187_vm1, %v2186_v8 }
 0x586   : > { %1771 = vmatpush3.bf16.msra.mxu1 %v1910_v24  ;;  %1779 = vmatpush3.bf16.msra.mxu0 %v1912_v15 }
 0x587   : > { %1772 = vmatprep.subr.bf16.mxu1 %v2186_v8  ;;  %1780 = vmatprep.subr.bf16.mxu0 %v2186_v8 }
 0x58a   : > { %1773 = vmatpush3.bf16.msra.mxu1 %v1911_v47 }
 0x58b   : > { %1786 = vmatprep.subr.bf16.mxu1 %v2186_v8 }
 0x657   : > { %v1088_v25 = vpop.f32.mrb[4].mxu1  ;;  %v1134_v26 = vpop.f32.mrb[8].mxu0 }
 0x658   : > { %v1140_v27 = vcombine.high %v1088_v25, %v2186_v8  ;;  %v1147_v28 = vrot.slane %v1088_v25, %v2514_v36  ;;  %v1155_v29 = vcombine.high %v1134_v26, %v2186_v8  ;;  %v1162_v30 = vrot.slane %v1134_v26, %v2514_v36  ;;  %v1762_v31 = vpop.f32.mrb[5].mxu1  ;;  %v1768_v32 = vpop.f32.mrb[9].mxu0 }
 0x659   : > { %v1091_v33 = vpop.f32.mrb[6].mxu1  ;;  %v1137_v34 = vpop.f32.mrb[10].mxu0  ;;  %v1702_v31 = vld [vmem:[%s2700_s11] ss:$0 sm:$0xff] }
 0x65a   : > { %v1154_v35 = vrot.slane %v1140_v27, %v2514_v36  ;;  %v1169_v37 = vrot.slane %v1155_v29, %v2514_v36  ;;  %v1170_v38 = vcombine.low %v1147_v28, %v1162_v30  ;;  %v1171_v39 = vcombine.high %v1147_v28, %v1162_v30  ;;  %v1763_v40 = vpop.f32.mrb[7].mxu1  ;;  %v1769_v41 = vpop.f32.mrb[11].mxu0  ;;  %v1914_v27 = vld [vmem:[%s2701_s12] sm:$0xff]   ;;  %v1915_v28 = vld [vmem:[%s2701_s12 + $0x8] sm:$0xff]   ;;  %v1916_v29 = vld [vmem:[%s2701_s12 + $0x10] sm:$0xff]  }
 0x65b   : > { %v1917_v30 = vld [vmem:[%s2701_s12 + $0x18] sm:$0xff]  }
 0x65c   : > { %v1178_v43 = vrot.slane %v1170_v38, %v2518_v42  ;;  %v1185_v44 = vrot.slane %v1171_v39, %v2518_v42  ;;  %v1186_v45 = vcombine.low %v1154_v35, %v1169_v37  ;;  %v1187_v46 = vcombine.high %v1154_v35, %v1169_v37 }
 0x65e   : > { %v1194_v48 = vrot.slane %v1186_v45, %v2518_v42  ;;  %v1201_v49 = vrot.slane %v1187_v46, %v2518_v42  ;;  %v1206_v50 = vcombine.low %v1178_v43, %v1185_v44  ;;  %v1694_v51 = vcombine.high %v1178_v43, %v1185_v44  ;;  %v1706_v44 = vld [vmem:[%s2702_s13] ss:$0 sm:$0xff] }
 0x660   : > { %v1213_v52 = vrot.slane %v1206_v50, %v2514_v36  ;;  %v1221_v53 = vrot.slane %v1694_v51, %v2514_v36  ;;  %v1222_v54 = vcombine.low %v1194_v48, %v1201_v49  ;;  %v1695_v55 = vcombine.high %v1194_v48, %v1201_v49 }
 0x662   : > { %v1229_v22 = vrot.slane %v1222_v54, %v2514_v36  ;;  %v1237_v56 = vrot.slane %v1695_v55, %v2514_v36  ;;  %v1238_v57 = vcombine.low %v1213_v52, %v1221_v53  ;;  %v1696_v36 = vld [vmem:[#allocation5] ss:$0 sm:$0xff] }
 0x664   : > { %v1246_v58 = vcombine.low %v1229_v22, %v1237_v56  ;;  %v1245_v59 = vrot.slane %v1238_v57, %v2518_v42 }
 0x666   : > { %v1253_v60 = vrot.slane %v1246_v58, %v2518_v42 }
 0x668   : > { %v1255_v61 = vcombine.high %v1245_v59, %v1253_v60  ;;  %v1254_v62 = vcombine.low %v1245_v59, %v1253_v60 }
 0x66a   : > { %1257 = vrot.lane.b32.xlu1 %v1255_v61, %s2195_s26  ;;  %s1674_s26 = sshll.u32 %s543_s16, 3 }
 0x66b   : > { %s545_s17 = scalar_lea.vmem [#allocation13], %s1674_s26 }
 0x66c   : > { %s1530_s25 = sshll.u32 %s545_s17, 4  ;;  %s2648_s25 = int_to_ptr.vmem [resolvable:$true] %s1530_s25 }
 0x66d   : > { %s2100_s28 = scalar_lea.vmem %s2648_s25, 128  ;;  %p2107_p13 = scmp.lt.s32.totalorder %s2648_s25, %s2105_s22 }
 0x66e   : > { %p2101_p4 = scmp.ne.s32.totalorder %s2648_s25, %s2100_s28  ;;  %p2108_p1 = scmp.lt.s32.totalorder %s2106_s23, %s2100_s28 }
 0x670   : > { %p2102_p8 = pnand %p2101_p4, %p2739_p7  ;;  %p2109_p0 = por %p2108_p1, %p2107_p13 }
 0x672   : > { %p2103_p11 = pneg %p2102_p8 }
 0x674   : > { %p2110_p6 = pnand %p2109_p0, %p2103_p11 }
 0x6dc   : > { %v1258_v63 = vpop.permute.xlu1 %1257 }
 0x6dd   : > { %v1260_v1 = vsel %vm927_vm2, %v1254_v62, %v1258_v63 }
 0x6de   : > { %v1261_v2 = vpack.c.bf16 %v1260_v1, %v1260_v1 }
 0x6e0   : > { %1775 = vmatmul.mubr.msk.bf16.vlgmr.msra.gmra.mrb[8].mxu1 %vm557_vm0, %v1261_v2 }
 0x6e1   : > { %1794 = vmatprep.mubr.msk.bf16.mxu1 %vm2187_vm1, %v2186_v8  ;;  %1787 = vmatpush3.bf16.msra.mxu1 %v1914_v27 }
 0x6e2   : > { %1788 = vmatprep.subr.bf16.mxu1 %v2186_v8 }
 0x6e5   : > { %1789 = vmatpush3.bf16.msra.mxu1 %v1915_v28 }
 0x6e6   : > { %1790 = vmatprep.subr.bf16.mxu1 %v2186_v8 }
 0x6e9   : > { %1791 = vmatpush3.bf16.msra.mxu1 %v1916_v29 }
 0x6ea   : > { %1792 = vmatprep.subr.bf16.mxu1 %v2186_v8 }
 0x6ed   : > { %1793 = vmatpush3.bf16.msra.mxu1 %v1917_v30 }
 0x7b3   : > { %v1322_v3 = vpop.f32.mrb[8].mxu1 }
 0x7b4   : > { %v1323_v4 = vadd.f32 %v1696_v36, %v1322_v3  ;;  %v1776_v5 = vpop.f32.mrb[9].mxu1 }
 0x7b5   : > { %v1325_v6 = vpop.f32.mrb[10].mxu1 }
 0x7b6   : > { %v2605_v42 = vadd.f32 %v1323_v4, %v2486_v0  ;;  %v1777_v7 = vpop.f32.mrb[11].mxu1  ;;  %v1913_v0 = vld [vmem:[%s2699_s10 + $0x8] sm:$0xff]  }
 0x7b7   : > { %1781 = vmatpush3.bf16.msra.mxu0 %v1913_v0 }
 0x7b8   : > { %v1331_v9 = vsel %vm557_vm0, %v2605_v42, 0.0 }
 0x7b9   : > { %1332 = vadd.xlane.f32.xlu1 %v1331_v9 }
 0x846   : > { %v1333_v10 = vpop.xlane.xlu1 %1332 }
 0x847   : > { %v1334_v11 = vmul.f32 0.03125, %v1333_v10 }
 0x849   : > { %v1335_v12 = vsub.f32 %v2605_v42, %v1334_v11 }
 0x84b   : > { %v1336_v13 = vmul.f32 %v1335_v12, %v1335_v12 }
 0x84d   : > { %v1337_v14 = vsel %vm557_vm0, %v1336_v13, 0.0 }
 0x84e   : > { %1338 = vadd.xlane.f32.xlu0 %v1337_v14 }
 0x8db   : > { %v1339_v16 = vpop.xlane.xlu0 %1338 }
 0x8dc   : > { %v1340_v17 = vmul.f32 0.03125, %v1339_v16 }
 0x8de   : > { %v1341_v18 = vadd.f32 1e-05, %v1340_v17 }
 0x8e0   : > { %1928 = vrsqrt.f32 %v1341_v18 }
 0x8ea   : > { %v1929_v19 = vpop.eup %1928 }
 0x8eb   : > { %v1343_v21 = vmul.f32 %v1929_v19, %v1335_v12 }
 0x8ed   : > { %v1350_v24 = vmul.f32 %v1700_v20, %v1343_v21 }
 0x8ef   : > { %v1357_v25 = vadd.f32 %v1701_v23, %v1350_v24 }
 0x8f1   : > { %v1358_v26 = vpack.c.bf16 %v1357_v25, %v1357_v25 }
 0x8f3   : > { %1783 = vmatmul.mubr.msk.bf16.vlgmr.msra.gmra.mrb[12].mxu0 %vm557_vm0, %v1358_v26 }
 0x9c6   : > { %v1419_v32 = vpop.f32.mrb[12].mxu0 }
 0x9c7   : > { %v1420_v33 = vadd.f32 %v1702_v31, %v1419_v32  ;;  %v1784_v34 = vpop.f32.mrb[13].mxu0 }
 0x9c8   : > { %v1422_v35 = vpop.f32.mrb[14].mxu0 }
 0x9c9   : > { %v1426_v37 = vmul.f32 0.70710677, %v1420_v33  ;;  %v1785_v38 = vpop.f32.mrb[15].mxu0  ;;  %v1425_v8 = vmul.f32 0.5, %v1420_v33 }
 0x9cb   : > { %1930 = verf.f32 %v1426_v37 }
 0x9d5   : > { %v1931_v39 = vpop.eup %1930 }
 0x9d6   : > { %v1428_v40 = vadd.f32 1.0, %v1931_v39 }
 0x9d8   : > { %v1429_v41 = vmul.f32 %v1428_v40, %v1425_v8 }
 0x9da   : > { %v1430_v43 = vpack.c.bf16 %v1429_v41, %v1429_v41 }
 0x9dc   : > { %1795 = vmatmul.mubr.msk.bf16.vlgmr.msra.gmra.mrb[12].mxu1 %vm1470_vm5, %v1430_v43 }
 0xaaf   : > { %v1508_v45 = vpop.f32.mrb[12].mxu1 }
 0xab0   : > { %v1509_v46 = vadd.f32 %v1706_v44, %v1508_v45  ;;  %v1796_v47 = vpop.f32.mrb[13].mxu1 }
 0xab1   : > { %v1511_v48 = vpop.f32.mrb[14].mxu1 }
 0xab2   : > { %v1514_v49 = vadd.f32 %v1509_v46, %v2605_v42  ;;  %v1797_v50 = vpop.f32.mrb[15].mxu1 }
 0xab4   : > { %1515 = vst.msk [vmem:[%s545_s17] sm:$0xff] %vm557_vm0, %v1514_v49 }
 0xab5   : > { %2113 = shalt.err (!%p2110_p6)
}
 0xab6   : > { %s2114_s16 = scalar_lea.hbm %s2646_s18, 128  ;;  %s2118_s5 = scalar_lea.hbm %s2738_s19, 256 }
 0xab7   : > { %p2115_p5 = scmp.ne.s32.totalorder %s2646_s18, %s2114_s16  ;;  %p2119_p10 = scmp.lt.u32.totalorder %s2646_s18, %s2738_s19 }
 0xab8   : > { %p2120_p2 = scmp.lt.u32.totalorder %s2118_s5, %s2114_s16  ;;  %p2122_p4 = scmp.lt.u32.totalorder %s2114_s16, %s2646_s18 }
 0xab9   : > { %p2116_p9 = pnand %p2115_p5, %p2739_p7 }
 0xaba   : > { %p2121_p3 = por %p2120_p2, %p2119_p10 }
 0xabb   : > { %p2117_p12 = pneg %p2116_p9 }
 0xabc   : > { %p2123_p8 = por %p2122_p4, %p2121_p3 }
 0xabe   : > { %p2124_p11 = pnand %p2123_p8, %p2117_p12 }
 0xac0   : > { %2127 = shalt.err (!%p2124_p11)
}
 0xac1   : > { %1822 = dma.vmem_to_hbm [thread:$0]  (%p2739_p7), %s2648_s25, 128, %s2646_s18, %s1517_s1  }
 0xac2 PF: > { %s2740_s27 = sld [smem:[#allocation21_spill]]  ;;  %s2741_s14 = sld [smem:[#allocation19_spill]] }
 0xac3   : > { %s2742_s15 = sld [smem:[#allocation24_spill]] }
 0xac8   : > { %p1859_p13 = scmp.ge.s32.totalorder %s2740_s27, 2  ;;  %s1542_s28 = sand.u32 1, %s2741_s14  }
 0xac9   : > { %p2743_p1 = scmp.ne.s32.totalorder %s2742_s15, 0  ;;  %s1543_s20 = scalar_lea.sflag [#allocation4], %s1542_s28 }
 0xacb   : > { %p1844_p0 = pnand %p1859_p13, %p2743_p1 }
 0xacd   : > { %2161 = dma.done.wait (!%p1844_p0), %s1543_s20, 128  }
 0xace   : > { %2163 = vsyncadd (!%p1844_p0), %s1543_s20, 4294967168  ;;  %s2744_s15 = sld [smem:[#allocation22_spill]]  ;;  %s2745_s22 = sld [smem:[#allocation20_spill]] }
 0xacf   : > { %s2746_s30 = sld [smem:[#allocation23_spill]]  ;;  %s2747_s28 = smov %s2170_s29 }
 0xad4   : > { %p28_p6 = scmp.ge.s32.totalorder %s2744_s15, 4   ;;  %s2748_s29 = smov %s2745_s22 }
 0xad6   :  { %30 = sbr.rel (!%p28_p6) target bundleno = 10 (0xa), region = 139 }
 0xadd   :  { %1548 = vsyncpa [#allocation3], 1 }
 0xade   :  { %1550 = vsyncpa [#allocation3 + $0x1], 1 }
 0xadf   :  { %1551 = vsyncpa [#allocation6], 1 }
 0xae0   :  { %1552 = vsyncpa [#allocation9], 1 }
 0xae1   :  { %1553 = vsyncpa [#allocation12], 1 }
 0xae2   :  { %1554 = vsyncpa [#allocation4], 1 }
 0xae3   :  { %1556 = vsyncpa [#allocation4 + $0x1], 1 }

// kernel: tpu_custom_call.1
= control target key start
LH: loop header
LB: loop body
LE: loop exit
PB: predicated region body
PF: predicated region fallthrough
CT: control target
= control target key end

     0   :  { %s2689_s0 = inlined_call_operand.vmem [shape: f32[2,8,32], index: 0, kind: input, shape index: {}]   ;;  %s2690_s1 = inlined_call_operand.vmem [shape: f32[2,1,8], index: 1, kind: input, shape index: {}]   ;;  %s2691_s2 = inlined_call_operand.vmem [shape: bf16[32,96], index: 2, kind: input, shape index: {}]   ;;  %s2692_s3 = inlined_call_operand.hbm [shape: f32[1,96], index: 3, kind: input, shape index: {}]   ;;  %s2693_s4 = inlined_call_operand.vmem [shape: bf16[32,32], index: 4, kind: input, shape index: {}]   ;;  %s2694_s5 = inlined_call_operand.hbm [shape: f32[1,32], index: 5, kind: input, shape index: {}]   ;;  %s2695_s6 = inlined_call_operand.hbm [shape: f32[1,32], index: 6, kind: input, shape index: {}]   ;;  %s2696_s7 = inlined_call_operand.hbm [shape: f32[1,32], index: 7, kind: input, shape index: {}]   ;;  %s2697_s8 = inlined_call_operand.hbm [shape: f32[1,32], index: 8, kind: input, shape index: {}]   ;;  %s2698_s9 = inlined_call_operand.hbm [shape: f32[1,32], index: 9, kind: input, shape index: {}]   ;;  %s2699_s10 = inlined_call_operand.vmem [shape: bf16[32,64], index: 10, kind: input, shape index: {}]   ;;  %s2700_s11 = inlined_call_operand.vmem [shape: f32[1,64], index: 11, kind: input, shape index: {}]   ;;  %s2701_s12 = inlined_call_operand.vmem [shape: bf16[64,32], index: 12, kind: input, shape index: {}]   ;;  %s2702_s13 = inlined_call_operand.vmem [shape: f32[1,32], index: 13, kind: input, shape index: {}]   ;;  %s2703_s14 = inlined_call_operand.hbm [shape: f32[2,8,32], index: 14, kind: output, shape index: {}]  }
   0x1   :  { %2714 = sst [smem:[#allocation25_spill]] %s2694_s5 }
   0x2   :  { %2715 = sst [smem:[#allocation26_spill]] %s2703_s14 }
   0x3   :  { %19 = vsyncpa [#allocation3], 0 }
   0x4   :  { %20 = vsyncpa [#allocation6], 0 }
   0x5   :  { %21 = vsyncpa [#allocation9], 0 }
   0x6   :  { %22 = vsyncpa [#allocation12], 0 }
   0x7   :  { %23 = vsyncpa [#allocation4], 0 }
   0x8   :  { %25 = vsyncpa [#allocation4 + $0x1], 0  ;;  %s2272_s28 = smov 0   ;;  %s2274_s29 = smov 0  }
   0x9   :  { %s2276_s30 = smov 0   ;;  %s2278_s15 = smov 0  }
   0xa LB: > { %2716 = sst [smem:[#allocation19_spill]] %s2166_s28  ;;  %s2293_s1 = sadd.s32 4294967295, %s2178_s15   ;;  %s2178_s15 = sphi %s2278_s15, %s2744_s15   ;;  %s2174_s30 = sphi %s2276_s30, %s2746_s30   ;;  %s2170_s29 = sphi %s2274_s29, %s2748_s29   ;;  %s2166_s28 = sphi %s2272_s28, %s2747_s28  }
   0xb   : > { %2717 = sst [smem:[#allocation20_spill]] %s2174_s30  ;;  %s1658_s16 = sadd.s32 4294967294, %s2178_s15  }
   0xc   : > { %2718 = sst [smem:[#allocation21_spill]] %s2178_s15  ;;  %s2297_s17 = sadd.s32 1, %s2178_s15  }
   0xd   : > { %2719 = sst [smem:[#allocation22_spill]] %s2297_s17  ;;  %s342_s18 = sadd.s32 1, %s2174_s30 }
   0xe   : > { %s339_s19 = ssub.s32 %s2178_s15, %s2297_s17  ;;  %p352_p0 = scmp.ne.s32.totalorder %s2174_s30, %s2170_s29 }
   0xf   : > { %p340_p1 = scmp.eq.s32.totalorder %s339_s19, 0  ;;  %p353_p2 = scmp.eq.s32.totalorder %s2293_s1, 1 }
  0x10   : > { %p358_p3 = scmp.ne.s32.totalorder %s2170_s29, %s2166_s28  ;;  %p359_p4 = scmp.eq.s32.totalorder %s1658_s16, 1 }
  0x11   : > { %s2308_s20 = scalar_select %p340_p1, %s2174_s30, %s342_s18  }
  0x12   : > { %p2310_p5 = por %p353_p2, %p352_p0  ;;  %p2314_p6 = por %p359_p4, %p358_p3 }
  0x13   : > { %2720 = sst [smem:[#allocation23_spill]] %s2308_s20  ;;  %p1659_p7 = scmp.ge.s32.totalorder %s2178_s15, 1 }
  0x14   : > { %s2721_s21 = scalar_select %p2310_p5, 1, 0 }
  0x15   : > { %s2722_s22 = scalar_select %p2314_p6, 1, 0 }
  0x16   : > { %p366_p8 = scmp.lt.s32.totalorder %s2178_s15, 3  ;;  %p2709_p9 = scmp.eq.s32.totalorder %s2293_s1, 0 }
  0x17   : > { %2723 = sst [smem:[#allocation24_spill]] %s2722_s22  ;;  %s2180_s24 = smov [#allocation5]  }
  0x18   : > { %p2321_p10 = pnand %p1659_p7, %p366_p8  ;;  %s396_s25 = sshll.u32 %s2180_s24, 4  ;;  %s397_s25 = int_to_ptr.vmem [resolvable:$true] %s396_s25 }
  0x19   : > { %s2181_s26 = smov [#allocation8]   ;;  %s2182_s18 = smov [#allocation2]  }
  0x1a   : > { %s2724_s23 = scalar_select %p2321_p10, 1, 0 }
  0x1b   : > { %p1824_p11 = pneg %p2321_p10  ;;  %s418_s27 = sshll.u32 %s2181_s26, 4  ;;  %s2333_s27 = int_to_ptr.vmem [resolvable:$true] %s418_s27 }
  0x1c   : > { %s382_s19 = sshll.u32 %s2182_s18, 4  ;;  %s2726_s5 = sld [smem:[#allocation25_spill]]  ;;  %s2335_s19 = int_to_ptr.vmem [resolvable:$true] %s382_s19 }
  0x1d   : > { %p2329_p12 = pnand %p2709_p9, %p1824_p11 }
  0x1f   : > { %p2345_p0 = pneg %p2329_p12 }
  0x22   : > { %s1932_s24 = scalar_lea.hbm %s2726_s5, 16 }
  0x23   : > { %p1933_p13 = scmp.ne.s32.totalorder %s2726_s5, %s1932_s24  ;;  %p1939_p3 = scmp.lt.u32.totalorder %s1932_s24, %s2726_s5 }
  0x25   : > { %p1935_p1 = pnand %p2345_p0, %p1933_p13 }
  0x27   : > { %p1936_p2 = pneg %p1935_p1 }
  0x29   : > { %p1941_p4 = pnand %p1939_p3, %p1936_p2 }
  0x2b   : > { %1944 = shalt.err (!%p1941_p4)
}
  0x2c   : > { %s1945_s30 = scalar_lea.vmem %s397_s25, 16  ;;  %s1952_s17 = scalar_lea.vmem %s397_s25, 32 }
  0x2d   : > { %p1946_p7 = scmp.ne.s32.totalorder %s397_s25, %s1945_s30  ;;  %p1953_p9 = scmp.lt.s32.totalorder %s397_s25, %s397_s25 }
  0x2e   : > { %p1954_p6 = scmp.lt.s32.totalorder %s1952_s17, %s1945_s30 }
  0x2f   : > { %p1948_p8 = pnand %p1946_p7, %p2345_p0 }
  0x30   : > { %p1955_p5 = por %p1954_p6, %p1953_p9 }
  0x31   : > { %p1949_p11 = pneg %p1948_p8 }
  0x33   : > { %p1956_p10 = pnand %p1955_p5, %p1949_p11 }
  0x35   : > { %1959 = shalt.err (!%p1956_p10)
}
  0x36   : > { %1830 = dma.hbm_to_vmem [thread:$0]  (!%p2329_p12), %s2726_s5, 16, %s397_s25, [#allocation6]  }
  0x37   : > { %s1960_s18 = scalar_lea.hbm %s2696_s7, 16 }
  0x38   : > { %p1961_p13 = scmp.ne.s32.totalorder %s2696_s7, %s1960_s18  ;;  %p1967_p5 = scmp.lt.u32.totalorder %s1960_s18, %s2696_s7 }
  0x3a   : > { %p1963_p1 = pnand %p1961_p13, %p2345_p0 }
  0x3c   : > { %p1964_p6 = pneg %p1963_p1 }
  0x3e   : > { %p1969_p9 = pnand %p1967_p5, %p1964_p6 }
  0x40   : > { %1972 = shalt.err (!%p1969_p9)
}
  0x41   : > { %s1973_s25 = scalar_lea.vmem %s2333_s27, 16  ;;  %s1980_s14 = scalar_lea.vmem %s2333_s27, 32 }
  0x42   : > { %p1974_p10 = scmp.ne.s32.totalorder %s2333_s27, %s1973_s25  ;;  %p1981_p4 = scmp.lt.s32.totalorder %s2333_s27, %s2333_s27 }
  0x43   : > { %p1982_p7 = scmp.lt.s32.totalorder %s1980_s14, %s1973_s25 }
  0x44   : > { %p1976_p2 = pnand %p1974_p10, %p2345_p0 }
  0x45   : > { %p1983_p8 = por %p1982_p7, %p1981_p4 }
  0x46   : > { %p1977_p3 = pneg %p1976_p2 }
  0x48   : > { %p1984_p11 = pnand %p1983_p8, %p1977_p3 }
  0x4a   : > { %1987 = shalt.err (!%p1984_p11)
}
  0x4b   : > { %1836 = dma.hbm_to_vmem [thread:$0]  (!%p2329_p12), %s2696_s7, 16, %s2333_s27, [#allocation9]  }
  0x4c   : > { %s1988_s24 = scalar_lea.hbm %s2692_s3, 16 }
  0x4d   : > { %p1989_p13 = scmp.ne.s32.totalorder %s2692_s3, %s1988_s24  ;;  %p1995_p5 = scmp.lt.u32.totalorder %s1988_s24, %s2692_s3 }
  0x4f   : > { %p1991_p1 = pnand %p1989_p13, %p2345_p0 }
  0x51   : > { %p1992_p6 = pneg %p1991_p1 }
  0x53   : > { %p1997_p9 = pnand %p1995_p5, %p1992_p6 }
  0x55   : > { %2000 = shalt.err (!%p1997_p9)
}
  0x56   : > { %s2001_s27 = scalar_lea.vmem %s2335_s19, 16  ;;  %s2008_s14 = scalar_lea.vmem %s2335_s19, 32 }
  0x57   : > { %p2002_p10 = scmp.ne.s32.totalorder %s2335_s19, %s2001_s27  ;;  %p2009_p4 = scmp.lt.s32.totalorder %s2335_s19, %s2335_s19 }
  0x58   : > { %p2010_p7 = scmp.lt.s32.totalorder %s2008_s14, %s2001_s27 }
  0x59   : > { %p2004_p2 = pnand %p2002_p10, %p2345_p0 }
  0x5a   : > { %p2011_p8 = por %p2010_p7, %p2009_p4 }
  0x5b   : > { %p2005_p3 = pneg %p2004_p2 }
  0x5d   : > { %p2012_p11 = pnand %p2011_p8, %p2005_p3 }
  0x5f   : > { %2015 = shalt.err (!%p2012_p11)
}
  0x60   : > { %1827 = dma.hbm_to_vmem [thread:$0]  (!%p2329_p12), %s2692_s3, 16, %s2335_s19, [#allocation3]  }
  0x61   : > { %s2183_s22 = smov [#allocation7]   ;;  %s2184_s24 = smov [#allocation10]  }
  0x62   : > { %s407_s28 = sshll.u32 %s2183_s22, 4  ;;  %s429_s18 = sshll.u32 %s2184_s24, 4  ;;  %s408_s28 = int_to_ptr.vmem [resolvable:$true] %s407_s28  ;;  %s430_s18 = int_to_ptr.vmem [resolvable:$true] %s429_s18 }
  0x63   : > { %s2016_s25 = scalar_lea.hbm %s2695_s6, 16 }
  0x64   : > { %p2017_p13 = scmp.ne.s32.totalorder %s2695_s6, %s2016_s25  ;;  %p2023_p5 = scmp.lt.u32.totalorder %s2016_s25, %s2695_s6 }
  0x66   : > { %p2019_p1 = pnand %p2017_p13, %p2345_p0 }
  0x68   : > { %p2020_p6 = pneg %p2019_p1 }
  0x6a   : > { %p2025_p9 = pnand %p2023_p5, %p2020_p6 }
  0x6c   : > { %2028 = shalt.err (!%p2025_p9)
}
  0x6d   : > { %s2029_s19 = scalar_lea.vmem %s408_s28, 16  ;;  %s2036_s20 = scalar_lea.vmem %s408_s28, 32 }
  0x6e   : > { %p2030_p10 = scmp.ne.s32.totalorder %s408_s28, %s2029_s19  ;;  %p2037_p4 = scmp.lt.s32.totalorder %s408_s28, %s408_s28 }
  0x6f   : > { %p2038_p7 = scmp.lt.s32.totalorder %s2036_s20, %s2029_s19 }
  0x70   : > { %p2032_p2 = pnand %p2030_p10, %p2345_p0 }
  0x71   : > { %p2039_p8 = por %p2038_p7, %p2037_p4 }
  0x72   : > { %p2033_p3 = pneg %p2032_p2 }
  0x74   : > { %p2040_p11 = pnand %p2039_p8, %p2033_p3 }
  0x76   : > { %2043 = shalt.err (!%p2040_p11)
}
  0x77   : > { %1833 = dma.hbm_to_vmem [thread:$0]  (!%p2329_p12), %s2695_s6, 16, %s408_s28, [#allocation6]  }
  0x78   : > { %s2044_s17 = scalar_lea.hbm %s2697_s8, 16 }
  0x79   : > { %p2045_p13 = scmp.ne.s32.totalorder %s2697_s8, %s2044_s17  ;;  %p2051_p5 = scmp.lt.u32.totalorder %s2044_s17, %s2697_s8 }
  0x7b   : > { %p2047_p1 = pnand %p2045_p13, %p2345_p0 }
  0x7d   : > { %p2048_p6 = pneg %p2047_p1 }
  0x7f   : > { %p2053_p9 = pnand %p2051_p5, %p2048_p6 }
  0x81   : > { %2056 = shalt.err (!%p2053_p9)
}
  0x82   : > { %s2057_s19 = scalar_lea.vmem %s430_s18, 16  ;;  %s2064_s28 = scalar_lea.vmem %s430_s18, 32 }
  0x83   : > { %p2058_p10 = scmp.ne.s32.totalorder %s430_s18, %s2057_s19  ;;  %p2065_p4 = scmp.lt.s32.totalorder %s430_s18, %s430_s18 }
  0x84   : > { %p2066_p7 = scmp.lt.s32.totalorder %s2064_s28, %s2057_s19 }
  0x85   : > { %p2060_p2 = pnand %p2058_p10, %p2345_p0 }
  0x86   : > { %p2067_p8 = por %p2066_p7, %p2065_p4 }
  0x87   : > { %p2061_p3 = pneg %p2060_p2 }
  0x89   : > { %p2068_p11 = pnand %p2067_p8, %p2061_p3 }
  0x8b   : > { %2071 = shalt.err (!%p2068_p11)
}
  0x8c   : > { %1839 = dma.hbm_to_vmem [thread:$0]  (!%p2329_p12), %s2697_s8, 16, %s430_s18, [#allocation9]  }
  0x8d   : > { %s2185_s24 = smov [#allocation11]   ;;  %s2072_s25 = scalar_lea.hbm %s2698_s9, 16 }
  0x8e   : > { %s440_s5 = sshll.u32 %s2185_s24, 4  ;;  %p2073_p13 = scmp.ne.s32.totalorder %s2698_s9, %s2072_s25  ;;  %s441_s5 = int_to_ptr.vmem [resolvable:$true] %s440_s5 }
  0x8f   : > { %p2079_p5 = scmp.lt.u32.totalorder %s2072_s25, %s2698_s9 }
  0x90   : > { %p2075_p1 = pnand %p2073_p13, %p2345_p0 }
  0x92   : > { %p2076_p6 = pneg %p2075_p1 }
  0x94   : > { %p2081_p9 = pnand %p2079_p5, %p2076_p6 }
  0x96   : > { %2084 = shalt.err (!%p2081_p9)
}
  0x97   : > { %s2085_s18 = scalar_lea.vmem %s441_s5, 16  ;;  %s2092_s28 = scalar_lea.vmem %s441_s5, 32 }
  0x98   : > { %p2086_p10 = scmp.ne.s32.totalorder %s441_s5, %s2085_s18  ;;  %p2093_p4 = scmp.lt.s32.totalorder %s441_s5, %s441_s5 }
  0x99   : > { %p2094_p7 = scmp.lt.s32.totalorder %s2092_s28, %s2085_s18 }
  0x9a   : > { %p2088_p2 = pnand %p2086_p10, %p2345_p0 }
  0x9b   : > { %p2095_p8 = por %p2094_p7, %p2093_p4 }
  0x9c   : > { %p2089_p3 = pneg %p2088_p2 }
  0x9e   : > { %p2096_p11 = pnand %p2095_p8, %p2089_p3 }
  0xa0   : > { %2099 = shalt.err (!%p2096_p11)
}
  0xa1   : > { %1842 = dma.hbm_to_vmem [thread:$0]  (!%p2329_p12), %s2698_s9, 16, %s441_s5, [#allocation12]  }
  0xa2   : > { %p2728_p13 = scmp.ne.s32.totalorder %s2724_s23, 0 }
  0xa3   : > { %p2729_p1 = scmp.eq.s32.totalorder (!%p2728_p13), %s2293_s1, 0 }
  0xa4   : > { %478 = sbr.rel (%p2728_p13) target bundleno = 2754 (0xac2), region = 76 }
  0xab   : > { %2145 = dma.done.wait (%p2729_p1), [#allocation3], 16   ;;  %p2730_p0 = pmov %p2729_p1 }
  0xad   : > { %2147 = vsyncadd (%p2730_p0), [#allocation3], 4294967280  ;;  %p2731_p6 = pmov %p2730_p0 }
  0xae   : > { %p2732_p5 = pmov %p2730_p0 }
  0xaf   : > { %2149 = dma.done.wait (%p2731_p6), [#allocation6], 32  }
  0xb0   : > { %2151 = vsyncadd (%p2732_p5), [#allocation6], 4294967264  ;;  %p2733_p9 = pmov %p2730_p0 }
  0xb1   : > { %p2734_p12 = pmov %p2730_p0 }
  0xb2   : > { %2153 = dma.done.wait (%p2733_p9), [#allocation9], 32  }
  0xb3   : > { %2155 = vsyncadd (%p2734_p12), [#allocation9], 4294967264  ;;  %p2735_p10 = pmov %p2730_p0 }
  0xb4   : > { %p2736_p2 = pmov %p2730_p0 }
  0xb5   : > { %2157 = dma.done.wait (%p2735_p10), [#allocation12], 16  }
  0xb6   : > { %2159 = vsyncadd (%p2736_p2), [#allocation12], 4294967280  ;;  %p546_p3 = scmp.lt.s32.totalorder %s2293_s1, 1  ;;  %vm557_vm0 = vcmask 261120   ;;  %v1908_v7 = vld [vmem:[%s2691_s2] sm:$0xff]   ;;  %v2186_v8 = vmov 0.0   ;;  %v674_v28 = vlaneseq }
  0xb7   : > { %1738 = vmatprep.subr.bf16.mxu0 %v2186_v8  ;;  %vm2187_vm1 = vmmov 0   ;;  %v1909_v9 = vld [vmem:[%s2691_s2 + $0x8] sm:$0xff]   ;;  %1746 = vmatprep.subr.bf16.mxu1 %v2186_v8  ;;  %v1676_v14 = vld [vmem:[#allocation7] ss:$0 sm:$0xff]  ;;  %v1677_v16 = vld [vmem:[#allocation8] ss:$0 sm:$0xff] }
  0xb8   : > { %s547_s23 = scalar_select %p546_p3, %s2293_s1, 1  ;;  %1742 = vmatprep.mubr.msk.bf16.mxu0 %vm2187_vm1, %v2186_v8  ;;  %1739 = vmatpush3.bf16.msra.mxu0 %v1908_v7  ;;  %v1678_v20 = vld [vmem:[#allocation2] ss:$0 sm:$0xff]  ;;  %v2191_v26 = vmov 1983009808   ;;  %v675_v32 = vshrl.u32 %v674_v28, 7 }
  0xb9   : > { %1740 = vmatprep.subr.bf16.mxu0 %v2186_v8  ;;  %1748 = vmatprep.mubr.msk.bf16.mxu1 %vm2187_vm1, %v2186_v8  ;;  %s2188_s14 = smov 80   ;;  %s2189_s15 = smov 112   ;;  %v672_v27 = vunpack.c.l.s4 %v2191_v26  ;;  %v2192_v29 = vmov 1934713408   ;;  %vm927_vm2 = vcmask 130048   ;;  %vm1022_vm3 = vcmask 64512  }
  0xba   : > { %s1675_s16 = sshll.u32 %s547_s23, 3  ;;  %s2190_s19 = smov 96   ;;  %v734_v30 = vunpack.c.l.s4 %v2192_v29  ;;  %vm1050_vm4 = vcmask 1043456   ;;  %vm1470_vm5 = vcmask 523264  }
  0xbb   : > { %s549_s5 = scalar_lea.vmem %s2689_s0, %s1675_s16  ;;  %v673_v31 = vunpack.c.0.s8 %v672_v27  ;;  %s2193_s18 = smov 48  }
  0xbc   : > { %v2486_v0 = vld [vmem:[%s549_s5] sm:$0xff]  ;;  %1741 = vmatpush3.bf16.msra.mxu0 %v1909_v9  ;;  %v735_v35 = vunpack.c.0.s8 %v734_v30  ;;  %s2194_s28 = smov 64   ;;  %s2195_s26 = smov 16  }
  0xbd   : > { %v558_v1 = vsel %vm557_vm0, %v2486_v0, 0.0  ;;  %1752 = vmatprep.subr.bf16.mxu0 %v2186_v8  ;;  %v2514_v36 = vsub.s32 %v673_v31, %v675_v32  ;;  %s543_s16 = sand.u32 1, %s2170_s29   ;;  %s1713_s30 = sshll.u32 %s2293_s1, 7 }
  0xbe   : > { %559 = vadd.xlane.f32.xlu0 %v558_v1  ;;  %v2518_v42 = vsub.s32 %v735_v35, %v675_v32  ;;  %s1517_s1 = scalar_lea.sflag [#allocation4], %s543_s16  ;;  %p2739_p7 = scmp.ne.s32.totalorder %s2721_s21, 0 }
  0xbf   : > { %s2196_s20 = smov [#allocation13]  }
  0xc0   : > { %s2104_s22 = sshll.u32 %s2196_s20, 4  ;;  %s2105_s22 = int_to_ptr.vmem [resolvable:$false] %s2104_s22 }
  0xc1   : > { %s2106_s23 = scalar_lea.vmem %s2105_s22, 256 }
 0x14b   : > { %v560_v2 = vpop.xlane.xlu0 %559 }
 0x14c   : > { %v562_v3 = vmul.f32 0.03125, %v560_v2 }
 0x14e   : > { %v563_v4 = vsub.f32 %v2486_v0, %v562_v3 }
 0x150   : > { %v564_v5 = vmul.f32 %v563_v4, %v563_v4 }
 0x152   : > { %v565_v6 = vsel %vm557_vm0, %v564_v5, 0.0 }
 0x153   : > { %566 = vadd.xlane.f32.xlu0 %v565_v6 }
 0x1e0   : > { %v567_v10 = vpop.xlane.xlu0 %566 }
 0x1e1   : > { %v568_v11 = vmul.f32 0.03125, %v567_v10 }
 0x1e3   : > { %v569_v12 = vadd.f32 1e-05, %v568_v11 }
 0x1e5   : > { %1918 = vrsqrt.f32 %v569_v12 }
 0x1ef   : > { %v1919_v13 = vpop.eup %1918 }
 0x1f0   : > { %v571_v15 = vmul.f32 %v1919_v13, %v563_v4 }
 0x1f2   : > { %v578_v17 = vmul.f32 %v1676_v14, %v571_v15 }
 0x1f4   : > { %v585_v18 = vadd.f32 %v1677_v16, %v578_v17 }
 0x1f6   : > { %v586_v19 = vpack.c.bf16 %v585_v18, %v585_v18 }
 0x1f8   : > { %1743 = vmatmul.mubr.msk.bf16.vlgmr.msra.gmra.mrb[0].mxu0 %vm557_vm0, %v586_v19 }
 0x1f9   : > { %1754 = vmatprep.mubr.msk.bf16.mxu0 %vm2187_vm1, %v2186_v8 }
 0x2cb   : > { %v647_v21 = vpop.f32.mrb[0].mxu0 }
 0x2cc   : > { %v2509_v22 = vadd.f32 %v1678_v20, %v647_v21  ;;  %v1744_v23 = vpop.f32.mrb[1].mxu0 }
 0x2cd   : > { %v650_v24 = vpop.f32.mrb[2].mxu0 }
 0x2ce   : > { %660 = vrot.lane.b32.xlu0 %v2509_v22, %s2188_s14  ;;  %654 = vrot.lane.b32.xlu1 %v2509_v22, %s2189_s15  ;;  %v1745_v25 = vpop.f32.mrb[3].mxu0  ;;  %s2737_s15 = sld [smem:[#allocation26_spill]] }
 0x2d2   : > { %657 = vrot.lane.b32.xlu1 %v2509_v22, %s2190_s19 }
 0x2d4   : > { %s2738_s19 = smov %s2737_s15 }
 0x340   : > { %v661_v33 = vpop.permute.xlu0 %660  ;;  %v655_v34 = vpop.permute.xlu1 %654 }
 0x341   : > { %v685_v37 = vcombine.low %v655_v34, %v661_v33  ;;  %v686_v38 = vcombine.high %v655_v34, %v661_v33 }
 0x343   : > { %v693_v43 = vrot.slane %v685_v37, %v2514_v36  ;;  %v700_v44 = vrot.slane %v686_v38, %v2514_v36 }
 0x344   : > { %v658_v39 = vpop.permute.xlu1 %657 }
 0x345   : > { %v669_v40 = vcombine.low %v2509_v22, %v658_v39  ;;  %v670_v41 = vcombine.high %v2509_v22, %v658_v39 }
 0x347   : > { %v677_v45 = vrot.slane %v669_v40, %v2514_v36  ;;  %v684_v46 = vrot.slane %v670_v41, %v2514_v36 }
 0x349   : > { %v731_v47 = vcombine.low %v677_v45, %v693_v43  ;;  %v732_v48 = vcombine.high %v677_v45, %v693_v43  ;;  %v747_v49 = vcombine.low %v684_v46, %v700_v44  ;;  %v748_v50 = vcombine.high %v684_v46, %v700_v44 }
 0x34b   : > { %v739_v51 = vrot.slane %v731_v47, %v2518_v42  ;;  %v746_v52 = vrot.slane %v732_v48, %v2518_v42  ;;  %v755_v53 = vrot.slane %v747_v49, %v2518_v42  ;;  %v762_v54 = vrot.slane %v748_v50, %v2518_v42 }
 0x34d   : > { %v1682_v55 = vcombine.low %v739_v51, %v746_v52  ;;  %v1684_v56 = vcombine.high %v739_v51, %v746_v52  ;;  %v1686_v57 = vcombine.low %v755_v53, %v762_v54  ;;  %v1688_v58 = vcombine.high %v755_v53, %v762_v54 }
 0x34f   : > { %v811_v59 = vrot.slane %v1682_v55, %v2514_v36  ;;  %v827_v60 = vrot.slane %v1684_v56, %v2514_v36  ;;  %v843_v61 = vrot.slane %v1686_v57, %v2514_v36  ;;  %v859_v62 = vrot.slane %v1688_v58, %v2514_v36 }
 0x351   : > { %v868_v63 = vcombine.high %v811_v59, %v827_v60  ;;  %v892_v1 = vcombine.high %v843_v61, %v859_v62  ;;  %v867_v2 = vcombine.low %v811_v59, %v827_v60  ;;  %v891_v4 = vcombine.low %v843_v61, %v859_v62 }
 0x353   : > { %v882_v3 = vrot.slane %v868_v63, %v2518_v42  ;;  %v906_v5 = vrot.slane %v892_v1, %v2518_v42  ;;  %v875_v11 = vrot.slane %v867_v2, %v2518_v42  ;;  %v899_v12 = vrot.slane %v891_v4, %v2518_v42 }
 0x355   : > { %v917_v6 = vcombine.low %v882_v3, %v906_v5  ;;  %v918_v7 = vcombine.high %v882_v3, %v906_v5  ;;  %v915_v15 = vcombine.low %v875_v11, %v899_v12  ;;  %v916_v16 = vcombine.high %v875_v11, %v899_v12 }
 0x357   : > { %v923_v9 = vpack.c.bf16 %v917_v6, %v917_v6  ;;  %v924_v10 = vpack.c.bf16 %v918_v7, %v918_v7  ;;  %v921_v17 = vpack.c.bf16 %v915_v15, %v915_v15  ;;  %v922_v18 = vpack.c.bf16 %v916_v16, %v916_v16 }
 0x359   : > { %v932_v13 = vsel %vm927_vm2, %v923_v9, 0  ;;  %v978_v14 = vsel %vm927_vm2, %v924_v10, 0 }
 0x35a   : > { %1747 = vmatpush3.bf16.xpose.msra.mxu1 %v932_v13  ;;  %1753 = vmatpush3.bf16.xpose.msra.mxu0 %v978_v14 }
 0x35b   : > { %1758 = vmatprep.subr.bf16.mxu1 %v2186_v8  ;;  %1764 = vmatprep.subr.bf16.mxu0 %v2186_v8 }
 0x361   : > { %1749 = vmatmul.mubr.msk.bf16.vlgmr.msra.gmra.mrb[0].mxu1 %vm927_vm2, %v921_v17  ;;  %1755 = vmatmul.mubr.msk.bf16.vlgmr.msra.gmra.mrb[4].mxu0 %vm927_vm2, %v922_v18 }
 0x362   : > { %1760 = vmatprep.mubr.msk.bf16.mxu1 %vm2187_vm1, %v2186_v8  ;;  %1766 = vmatprep.mubr.msk.bf16.mxu0 %vm2187_vm1, %v2186_v8 }
 0x434   : > { %v968_v19 = vpop.f32.mrb[0].mxu1  ;;  %v1014_v20 = vpop.f32.mrb[4].mxu0 }
 0x435   : > { %v1020_v21 = vmul.f32 0.25, %v968_v19  ;;  %v1021_v23 = vmul.f32 0.25, %v1014_v20  ;;  %v1750_v24 = vpop.f32.mrb[1].mxu1  ;;  %v1756_v25 = vpop.f32.mrb[5].mxu0 }
 0x436   : > { %v971_v26 = vpop.f32.mrb[2].mxu1  ;;  %v1017_v27 = vpop.f32.mrb[6].mxu0  ;;  %v1910_v24 = vld [vmem:[%s2693_s4] sm:$0xff]  }
 0x437   : > { %v1751_v28 = vpop.f32.mrb[3].mxu1  ;;  %v1757_v29 = vpop.f32.mrb[7].mxu0  ;;  %v1023_v30 = vsel %vm1022_vm3, %v1020_v21, -inf  ;;  %v1026_v31 = vsel %vm1022_vm3, %v1021_v23, -inf }
 0x438   : > { %1024 = vmax.xlane.f32.xlu1 %v1023_v30  ;;  %1027 = vmax.xlane.f32.xlu0 %v1026_v31 }
 0x44e   : > { %666 = vrot.lane.b32.xlu0 %v2509_v22, %s2193_s18  ;;  %s2646_s18 = scalar_lea.hbm %s2737_s15, %s1713_s30 }
 0x4c5   : > { %v1025_v32 = vpop.xlane.xlu1 %1024  ;;  %v1028_v33 = vpop.xlane.xlu0 %1027 }
 0x4c6   : > { %v1029_v34 = vsub.f32 %v1020_v21, %v1025_v32  ;;  %v1030_v35 = vsub.f32 %v1021_v23, %v1028_v33 }
 0x4c8   : > { %v1031_v37 = vmul.f32 1.442695, %v1029_v34  ;;  %v1033_v38 = vmul.f32 1.442695, %v1030_v35 }
 0x4c9   : > { %v667_v45 = vpop.permute.xlu0 %666 }
 0x4ca   : > { %1920 = vpow2.f32 %v1031_v37  ;;  %v716_v47 = vcombine.high %v667_v45, %v2186_v8  ;;  %v723_v49 = vrot.slane %v667_v45, %v2514_v36 }
 0x4cb   : > { %1922 = vpow2.f32 %v1033_v38 }
 0x4cc   : > { %v730_v52 = vrot.slane %v716_v47, %v2514_v36  ;;  %v1911_v47 = vld [vmem:[%s2693_s4 + $0x8] sm:$0xff]  }
 0x4d4   : > { %v1921_v39 = vpop.eup %1920 }
 0x4d5   : > { %v1035_v40 = vsel %vm1022_vm3, %v1921_v39, 0.0  ;;  %v1923_v41 = vpop.eup %1922 }
 0x4d6   : > { %1036 = vadd.xlane.f32.xlu1 %v1035_v40  ;;  %v1038_v43 = vsel %vm1022_vm3, %v1923_v41, 0.0 }
 0x4da   : > { %1039 = vadd.xlane.f32.xlu1 %v1038_v43 }
 0x4eb   : > { %663 = vrot.lane.b32.xlu1 %v2509_v22, %s2194_s28 }
 0x563   : > { %v1037_v44 = vpop.xlane.xlu1 %1036 }
 0x564   : > { %1924 = vrcp.f32 %v1037_v44 }
 0x567   : > { %v1040_v46 = vpop.xlane.xlu1 %1039 }
 0x568   : > { %1926 = vrcp.f32 %v1040_v46 }
 0x56b   : > { %v664_v48 = vpop.permute.xlu1 %663 }
 0x56c   : > { %v701_v50 = vcombine.high %v664_v48, %v2186_v8  ;;  %v708_v51 = vrot.slane %v664_v48, %v2514_v36 }
 0x56e   : > { %v715_v53 = vrot.slane %v701_v50, %v2514_v36  ;;  %v763_v54 = vcombine.low %v708_v51, %v723_v49  ;;  %v764_v55 = vcombine.high %v708_v51, %v723_v49  ;;  %v1925_v9 = vpop.eup %1924 }
 0x56f   : > { %v1043_v15 = vmul.f32 %v1925_v9, %v1921_v39 }
 0x570   : > { %v771_v22 = vrot.slane %v763_v54, %v2518_v42  ;;  %v778_v56 = vrot.slane %v764_v55, %v2518_v42  ;;  %v779_v57 = vcombine.low %v715_v53, %v730_v52  ;;  %v780_v58 = vcombine.high %v715_v53, %v730_v52 }
 0x571   : > { %v1045_v21 = vpack.c.bf16 %v1043_v15, %v1043_v15  ;;  %v1912_v15 = vld [vmem:[%s2699_s10] sm:$0xff]  }
 0x572   : > { %v787_v59 = vrot.slane %v779_v57, %v2518_v42  ;;  %v794_v60 = vrot.slane %v780_v58, %v2518_v42  ;;  %v1683_v61 = vcombine.low %v771_v22, %v778_v56  ;;  %v1685_v62 = vcombine.high %v771_v22, %v778_v56  ;;  %v1927_v12 = vpop.eup %1926 }
 0x573   : > { %v1044_v16 = vmul.f32 %v1927_v12, %v1923_v41 }
 0x574   : > { %v818_v63 = vrot.slane %v1683_v61, %v2514_v36  ;;  %v834_v1 = vrot.slane %v1685_v62, %v2514_v36  ;;  %v1687_v2 = vcombine.low %v787_v59, %v794_v60  ;;  %v1689_v3 = vcombine.high %v787_v59, %v794_v60 }
 0x575   : > { %v1046_v23 = vpack.c.bf16 %v1044_v16, %v1044_v16 }
 0x576   : > { %v850_v4 = vrot.slane %v1687_v2, %v2514_v36  ;;  %v866_v5 = vrot.slane %v1689_v3, %v2514_v36  ;;  %v883_v6 = vcombine.low %v818_v63, %v834_v1 }
 0x578   : > { %v907_v7 = vcombine.low %v850_v4, %v866_v5  ;;  %v890_v10 = vrot.slane %v883_v6, %v2518_v42 }
 0x57a   : > { %v914_v11 = vrot.slane %v907_v7, %v2518_v42 }
 0x57c   : > { %v919_v13 = vcombine.low %v890_v10, %v914_v11  ;;  %v920_v14 = vcombine.high %v890_v10, %v914_v11 }
 0x57e   : > { %v925_v17 = vpack.c.bf16 %v919_v13, %v919_v13  ;;  %v926_v18 = vpack.c.bf16 %v920_v14, %v920_v14 }
 0x580   : > { %v1052_v19 = vsel %vm1050_vm4, %v925_v17, 0  ;;  %v1098_v20 = vsel %vm1050_vm4, %v926_v18, 0 }
 0x581   : > { %1759 = vmatpush3.bf16.msra.mxu1 %v1052_v19  ;;  %1765 = vmatpush3.bf16.msra.mxu0 %v1098_v20  ;;  %v1700_v20 = vld [vmem:[#allocation10] ss:$0 sm:$0xff] }
 0x582   : > { %1770 = vmatprep.subr.bf16.mxu1 %v2186_v8  ;;  %1778 = vmatprep.subr.bf16.mxu0 %v2186_v8 }
 0x584   : > { %1761 = vmatmul.mubr.msk.bf16.vlgmr.msra.gmra.mrb[4].mxu1 %vm1022_vm3, %v1045_v21  ;;  %1767 = vmatmul.mubr.msk.bf16.vlgmr.msra.gmra.mrb[8].mxu0 %vm1022_vm3, %v1046_v23  ;;  %v1701_v23 = vld [vmem:[#allocation11] ss:$0 sm:$0xff] }
 0x585   : > { %1774 = vmatprep.mubr.msk.bf16.mxu1 %vm2187_vm1, %v2186_v8  ;;  %1782 = vmatprep.mubr.msk.bf16.mxu0 %vm2187_vm1, %v2186_v8 }
 0x586   : > { %1771 = vmatpush3.bf16.msra.mxu1 %v1910_v24  ;;  %1779 = vmatpush3.bf16.msra.mxu0 %v1912_v15 }
 0x587   : > { %1772 = vmatprep.subr.bf16.mxu1 %v2186_v8  ;;  %1780 = vmatprep.subr.bf16.mxu0 %v2186_v8 }
 0x58a   : > { %1773 = vmatpush3.bf16.msra.mxu1 %v1911_v47 }
 0x58b   : > { %1786 = vmatprep.subr.bf16.mxu1 %v2186_v8 }
 0x657   : > { %v1088_v25 = vpop.f32.mrb[4].mxu1  ;;  %v1134_v26 = vpop.f32.mrb[8].mxu0 }
 0x658   : > { %v1140_v27 = vcombine.high %v1088_v25, %v2186_v8  ;;  %v1147_v28 = vrot.slane %v1088_v25, %v2514_v36  ;;  %v1155_v29 = vcombine.high %v1134_v26, %v2186_v8  ;;  %v1162_v30 = vrot.slane %v1134_v26, %v2514_v36  ;;  %v1762_v31 = vpop.f32.mrb[5].mxu1  ;;  %v1768_v32 = vpop.f32.mrb[9].mxu0 }
 0x659   : > { %v1091_v33 = vpop.f32.mrb[6].mxu1  ;;  %v1137_v34 = vpop.f32.mrb[10].mxu0  ;;  %v1702_v31 = vld [vmem:[%s2700_s11] ss:$0 sm:$0xff] }
 0x65a   : > { %v1154_v35 = vrot.slane %v1140_v27, %v2514_v36  ;;  %v1169_v37 = vrot.slane %v1155_v29, %v2514_v36  ;;  %v1170_v38 = vcombine.low %v1147_v28, %v1162_v30  ;;  %v1171_v39 = vcombine.high %v1147_v28, %v1162_v30  ;;  %v1763_v40 = vpop.f32.mrb[7].mxu1  ;;  %v1769_v41 = vpop.f32.mrb[11].mxu0  ;;  %v1914_v27 = vld [vmem:[%s2701_s12] sm:$0xff]   ;;  %v1915_v28 = vld [vmem:[%s2701_s12 + $0x8] sm:$0xff]   ;;  %v1916_v29 = vld [vmem:[%s2701_s12 + $0x10] sm:$0xff]  }
 0x65b   : > { %v1917_v30 = vld [vmem:[%s2701_s12 + $0x18] sm:$0xff]  }
 0x65c   : > { %v1178_v43 = vrot.slane %v1170_v38, %v2518_v42  ;;  %v1185_v44 = vrot.slane %v1171_v39, %v2518_v42  ;;  %v1186_v45 = vcombine.low %v1154_v35, %v1169_v37  ;;  %v1187_v46 = vcombine.high %v1154_v35, %v1169_v37 }
 0x65e   : > { %v1194_v48 = vrot.slane %v1186_v45, %v2518_v42  ;;  %v1201_v49 = vrot.slane %v1187_v46, %v2518_v42  ;;  %v1206_v50 = vcombine.low %v1178_v43, %v1185_v44  ;;  %v1694_v51 = vcombine.high %v1178_v43, %v1185_v44  ;;  %v1706_v44 = vld [vmem:[%s2702_s13] ss:$0 sm:$0xff] }
 0x660   : > { %v1213_v52 = vrot.slane %v1206_v50, %v2514_v36  ;;  %v1221_v53 = vrot.slane %v1694_v51, %v2514_v36  ;;  %v1222_v54 = vcombine.low %v1194_v48, %v1201_v49  ;;  %v1695_v55 = vcombine.high %v1194_v48, %v1201_v49 }
 0x662   : > { %v1229_v22 = vrot.slane %v1222_v54, %v2514_v36  ;;  %v1237_v56 = vrot.slane %v1695_v55, %v2514_v36  ;;  %v1238_v57 = vcombine.low %v1213_v52, %v1221_v53  ;;  %v1696_v36 = vld [vmem:[#allocation5] ss:$0 sm:$0xff] }
 0x664   : > { %v1246_v58 = vcombine.low %v1229_v22, %v1237_v56  ;;  %v1245_v59 = vrot.slane %v1238_v57, %v2518_v42 }
 0x666   : > { %v1253_v60 = vrot.slane %v1246_v58, %v2518_v42 }
 0x668   : > { %v1255_v61 = vcombine.high %v1245_v59, %v1253_v60  ;;  %v1254_v62 = vcombine.low %v1245_v59, %v1253_v60 }
 0x66a   : > { %1257 = vrot.lane.b32.xlu1 %v1255_v61, %s2195_s26  ;;  %s1674_s26 = sshll.u32 %s543_s16, 3 }
 0x66b   : > { %s545_s17 = scalar_lea.vmem [#allocation13], %s1674_s26 }
 0x66c   : > { %s1530_s25 = sshll.u32 %s545_s17, 4  ;;  %s2648_s25 = int_to_ptr.vmem [resolvable:$true] %s1530_s25 }
 0x66d   : > { %s2100_s28 = scalar_lea.vmem %s2648_s25, 128  ;;  %p2107_p13 = scmp.lt.s32.totalorder %s2648_s25, %s2105_s22 }
 0x66e   : > { %p2101_p4 = scmp.ne.s32.totalorder %s2648_s25, %s2100_s28  ;;  %p2108_p1 = scmp.lt.s32.totalorder %s2106_s23, %s2100_s28 }
 0x670   : > { %p2102_p8 = pnand %p2101_p4, %p2739_p7  ;;  %p2109_p0 = por %p2108_p1, %p2107_p13 }
 0x672   : > { %p2103_p11 = pneg %p2102_p8 }
 0x674   : > { %p2110_p6 = pnand %p2109_p0, %p2103_p11 }
 0x6dc   : > { %v1258_v63 = vpop.permute.xlu1 %1257 }
 0x6dd   : > { %v1260_v1 = vsel %vm927_vm2, %v1254_v62, %v1258_v63 }
 0x6de   : > { %v1261_v2 = vpack.c.bf16 %v1260_v1, %v1260_v1 }
 0x6e0   : > { %1775 = vmatmul.mubr.msk.bf16.vlgmr.msra.gmra.mrb[8].mxu1 %vm557_vm0, %v1261_v2 }
 0x6e1   : > { %1794 = vmatprep.mubr.msk.bf16.mxu1 %vm2187_vm1, %v2186_v8  ;;  %1787 = vmatpush3.bf16.msra.mxu1 %v1914_v27 }
 0x6e2   : > { %1788 = vmatprep.subr.bf16.mxu1 %v2186_v8 }
 0x6e5   : > { %1789 = vmatpush3.bf16.msra.mxu1 %v1915_v28 }
 0x6e6   : > { %1790 = vmatprep.subr.bf16.mxu1 %v2186_v8 }
 0x6e9   : > { %1791 = vmatpush3.bf16.msra.mxu1 %v1916_v29 }
 0x6ea   : > { %1792 = vmatprep.subr.bf16.mxu1 %v2186_v8 }
 0x6ed   : > { %1793 = vmatpush3.bf16.msra.mxu1 %v1917_v30 }
 0x7b3   : > { %v1322_v3 = vpop.f32.mrb[8].mxu1 }
 0x7b4   : > { %v1323_v4 = vadd.f32 %v1696_v36, %v1322_v3  ;;  %v1776_v5 = vpop.f32.mrb[9].mxu1 }
 0x7b5   : > { %v1325_v6 = vpop.f32.mrb[10].mxu1 }
 0x7b6   : > { %v2605_v42 = vadd.f32 %v1323_v4, %v2486_v0  ;;  %v1777_v7 = vpop.f32.mrb[11].mxu1  ;;  %v1913_v0 = vld [vmem:[%s2699_s10 + $0x8] sm:$0xff]  }
 0x7b7   : > { %1781 = vmatpush3.bf16.msra.mxu0 %v1913_v0 }
 0x7b8   : > { %v1331_v9 = vsel %vm557_vm0, %v2605_v42, 0.0 }
 0x7b9   : > { %1332 = vadd.xlane.f32.xlu1 %v1331_v9 }
 0x846   : > { %v1333_v10 = vpop.xlane.xlu1 %1332 }
 0x847   : > { %v1334_v11 = vmul.f32 0.03125, %v1333_v10 }
 0x849   : > { %v1335_v12 = vsub.f32 %v2605_v42, %v1334_v11 }
 0x84b   : > { %v1336_v13 = vmul.f32 %v1335_v12, %v1335_v12 }
 0x84d   : > { %v1337_v14 = vsel %vm557_vm0, %v1336_v13, 0.0 }
 0x84e   : > { %1338 = vadd.xlane.f32.xlu0 %v1337_v14 }
 0x8db   : > { %v1339_v16 = vpop.xlane.xlu0 %1338 }
 0x8dc   : > { %v1340_v17 = vmul.f32 0.03125, %v1339_v16 }
 0x8de   : > { %v1341_v18 = vadd.f32 1e-05, %v1340_v17 }
 0x8e0   : > { %1928 = vrsqrt.f32 %v1341_v18 }
 0x8ea   : > { %v1929_v19 = vpop.eup %1928 }
 0x8eb   : > { %v1343_v21 = vmul.f32 %v1929_v19, %v1335_v12 }
 0x8ed   : > { %v1350_v24 = vmul.f32 %v1700_v20, %v1343_v21 }
 0x8ef   : > { %v1357_v25 = vadd.f32 %v1701_v23, %v1350_v24 }
 0x8f1   : > { %v1358_v26 = vpack.c.bf16 %v1357_v25, %v1357_v25 }
 0x8f3   : > { %1783 = vmatmul.mubr.msk.bf16.vlgmr.msra.gmra.mrb[12].mxu0 %vm557_vm0, %v1358_v26 }
 0x9c6   : > { %v1419_v32 = vpop.f32.mrb[12].mxu0 }
 0x9c7   : > { %v1420_v33 = vadd.f32 %v1702_v31, %v1419_v32  ;;  %v1784_v34 = vpop.f32.mrb[13].mxu0 }
 0x9c8   : > { %v1422_v35 = vpop.f32.mrb[14].mxu0 }
 0x9c9   : > { %v1426_v37 = vmul.f32 0.70710677, %v1420_v33  ;;  %v1785_v38 = vpop.f32.mrb[15].mxu0  ;;  %v1425_v8 = vmul.f32 0.5, %v1420_v33 }
 0x9cb   : > { %1930 = verf.f32 %v1426_v37 }
 0x9d5   : > { %v1931_v39 = vpop.eup %1930 }
 0x9d6   : > { %v1428_v40 = vadd.f32 1.0, %v1931_v39 }
 0x9d8   : > { %v1429_v41 = vmul.f32 %v1428_v40, %v1425_v8 }
 0x9da   : > { %v1430_v43 = vpack.c.bf16 %v1429_v41, %v1429_v41 }
 0x9dc   : > { %1795 = vmatmul.mubr.msk.bf16.vlgmr.msra.gmra.mrb[12].mxu1 %vm1470_vm5, %v1430_v43 }
 0xaaf   : > { %v1508_v45 = vpop.f32.mrb[12].mxu1 }
 0xab0   : > { %v1509_v46 = vadd.f32 %v1706_v44, %v1508_v45  ;;  %v1796_v47 = vpop.f32.mrb[13].mxu1 }
 0xab1   : > { %v1511_v48 = vpop.f32.mrb[14].mxu1 }
 0xab2   : > { %v1514_v49 = vadd.f32 %v1509_v46, %v2605_v42  ;;  %v1797_v50 = vpop.f32.mrb[15].mxu1 }
 0xab4   : > { %1515 = vst.msk [vmem:[%s545_s17] sm:$0xff] %vm557_vm0, %v1514_v49 }
 0xab5   : > { %2113 = shalt.err (!%p2110_p6)
}
 0xab6   : > { %s2114_s16 = scalar_lea.hbm %s2646_s18, 128  ;;  %s2118_s5 = scalar_lea.hbm %s2738_s19, 256 }
 0xab7   : > { %p2115_p5 = scmp.ne.s32.totalorder %s2646_s18, %s2114_s16  ;;  %p2119_p10 = scmp.lt.u32.totalorder %s2646_s18, %s2738_s19 }
 0xab8   : > { %p2120_p2 = scmp.lt.u32.totalorder %s2118_s5, %s2114_s16  ;;  %p2122_p4 = scmp.lt.u32.totalorder %s2114_s16, %s2646_s18 }
 0xab9   : > { %p2116_p9 = pnand %p2115_p5, %p2739_p7 }
 0xaba   : > { %p2121_p3 = por %p2120_p2, %p2119_p10 }
 0xabb   : > { %p2117_p12 = pneg %p2116_p9 }
 0xabc   : > { %p2123_p8 = por %p2122_p4, %p2121_p3 }
 0xabe   : > { %p2124_p11 = pnand %p2123_p8, %p2117_p12 }
 0xac0   : > { %2127 = shalt.err (!%p2124_p11)
}
 0xac1   : > { %1822 = dma.vmem_to_hbm [thread:$0]  (%p2739_p7), %s2648_s25, 128, %s2646_s18, %s1517_s1  }
 0xac2 PF: > { %s2740_s27 = sld [smem:[#allocation21_spill]]  ;;  %s2741_s14 = sld [smem:[#allocation19_spill]] }
 0xac3   : > { %s2742_s15 = sld [smem:[#allocation24_spill]] }
 0xac8   : > { %p1859_p13 = scmp.ge.s32.totalorder %s2740_s27, 2  ;;  %s1542_s28 = sand.u32 1, %s2741_s14  }
 0xac9   : > { %p2743_p1 = scmp.ne.s32.totalorder %s2742_s15, 0  ;;  %s1543_s20 = scalar_lea.sflag [#allocation4], %s1542_s28 }
 0xacb   : > { %p1844_p0 = pnand %p1859_p13, %p2743_p1 }
 0xacd   : > { %2161 = dma.done.wait (!%p1844_p0), %s1543_s20, 128  }
 0xace   : > { %2163 = vsyncadd (!%p1844_p0), %s1543_s20, 4294967168  ;;  %s2744_s15 = sld [smem:[#allocation22_spill]]  ;;  %s2745_s22 = sld [smem:[#allocation20_spill]] }
 0xacf   : > { %s2746_s30 = sld [smem:[#allocation23_spill]]  ;;  %s2747_s28 = smov %s2170_s29 }
 0xad4   : > { %p28_p6 = scmp.ge.s32.totalorder %s2744_s15, 4   ;;  %s2748_s29 = smov %s2745_s22 }
 0xad6   :  { %30 = sbr.rel (!%p28_p6) target bundleno = 10 (0xa), region = 139 }
 0xadd   :  { %1548 = vsyncpa [#allocation3], 1 }
 0xade   :  { %1550 = vsyncpa [#allocation3 + $0x1], 1 }
 0xadf   :  { %1551 = vsyncpa [#allocation6], 1 }
 0xae0   :  { %1552 = vsyncpa [#allocation9], 1 }
 0xae1   :  { %1553 = vsyncpa [#allocation12], 1 }
 0xae2   :  { %1554 = vsyncpa [#allocation4], 1 }
 0xae3   :  { %1556 = vsyncpa [#allocation4 + $0x1], 1 }

</bundles_post_ra>
